<compile_context>
chip_gen: v6e
topology: v6e:2x2x1
jax: 0.10.0
libtpu: 0.0.40
codegen_flags: <defaults>
</compile_context>

<pallas_src>
import jax
import jax.numpy as jnp
from jax.experimental import pallas as pl
from jax.experimental.pallas import tpu as pltpu

B = 2
L_IN = 120           # -> 39 -> 12 -> 3 after the three MaxPool1d(5, stride=3)
C_IN = 6
C_HID = 64
N_CLASS = 8
K = 5                # conv kernel size
PAD = (K - 1) // 2   # 'same' padding = 2
POOL_K, POOL_S = 5, 3
BN_EPS = 1e-5

L1, L2, L3 = 120, 39, 12     # conv output lengths per stage
P1, P2, P3 = 39, 12, 3       # pooled lengths per stage
FC_PAD = 128                 # lane-dense fc1 hidden / fc2 output width


def cnn1d_kernel(x_ref,
                 w1_ref, b1_ref, s1_ref, t1_ref,
                 w2_ref, b2_ref, s2_ref, t2_ref,
                 w3_ref, b3_ref, s3_ref, t3_ref,
                 fc1w_ref, fc1b_ref, fc2w_ref, fc2b_ref,
                 o_ref,
                 y1_ref, pad2_ref, y2_ref, pad3_ref, y3_ref):
    # Zero only the 2-row halos of the padded staging buffers; the center rows are
    # fully overwritten by the pooled+BN stores below.
    halo = jnp.zeros((B, PAD, C_HID), jnp.float32)
    pad2_ref[:, pl.ds(0, PAD), :] = halo
    pad2_ref[:, pl.ds(PAD + P1, PAD), :] = halo
    pad3_ref[:, pl.ds(0, PAD), :] = halo
    pad3_ref[:, pl.ds(PAD + P2, PAD), :] = halo

    # ---- stage 1: Conv1d(6->64, k=5, pad=2) + ReLU -----------------------------
    # Input was im2col'd in the wrapper to (B, 120, K*Cin=30) bf16; one matmul.
    z1 = jax.lax.dot_general(x_ref[...], w1_ref[...],
                             dimension_numbers=(((2,), (0,)), ((), ())),
                             preferred_element_type=jnp.float32)
    y1_ref[...] = jnp.maximum(z1 + b1_ref[...], 0.0)

    # MaxPool1d(5, 3) via 5 sublane-strided ref reads; BatchNorm folded scale/shift;
    # write into the center of the next stage's padded scratch.
    pooled = y1_ref[:, pl.ds(0, P1, stride=POOL_S), :]
    for j in range(1, POOL_K):
        pooled = jnp.maximum(pooled, y1_ref[:, pl.ds(j, P1, stride=POOL_S), :])
    pad2_ref[:, pl.ds(PAD, P1), :] = pooled * s1_ref[...] + t1_ref[...]

    # ---- stage 2: Conv1d(64->64) as one im2col matmul (K*Cin = 320 deep) -------
    lhs2 = jnp.concatenate([pad2_ref[:, pl.ds(i, L2), :] for i in range(K)],
                           axis=-1).astype(jnp.bfloat16)
    z2 = jax.lax.dot_general(lhs2, w2_ref[...],
                             dimension_numbers=(((2,), (0,)), ((), ())),
                             preferred_element_type=jnp.float32)
    y2_ref[...] = jnp.maximum(z2 + b2_ref[...], 0.0)

    pooled = y2_ref[:, pl.ds(0, P2, stride=POOL_S), :]
    for j in range(1, POOL_K):
        pooled = jnp.maximum(pooled, y2_ref[:, pl.ds(j, P2, stride=POOL_S), :])
    pad3_ref[:, pl.ds(PAD, P2), :] = pooled * s2_ref[...] + t2_ref[...]

    # ---- stage 3: same im2col form ---------------------------------------------
    lhs3 = jnp.concatenate([pad3_ref[:, pl.ds(i, L3), :] for i in range(K)],
                           axis=-1).astype(jnp.bfloat16)
    z3 = jax.lax.dot_general(lhs3, w3_ref[...],
                             dimension_numbers=(((2,), (0,)), ((), ())),
                             preferred_element_type=jnp.float32)
    y3_ref[...] = jnp.maximum(z3 + b3_ref[...], 0.0)

    pooled = y3_ref[:, pl.ds(0, P3, stride=POOL_S), :]
    for j in range(1, POOL_K):
        pooled = jnp.maximum(pooled, y3_ref[:, pl.ds(j, P3, stride=POOL_S), :])
    pooled = pooled * s3_ref[...] + t3_ref[...]            # (B, 3, 64) f32

    # ---- fc1: one (B,192)@(192,128) matmul --------------------------------------
    # fc1w was re-ordered to position-major (l*64 + c) rows and zero-padded to 128
    # out columns, so a lane-concat of the 3 pooled positions is the exact flatten.
    flat = jnp.concatenate([pooled[:, l, :] for l in range(P3)],
                           axis=-1).astype(jnp.bfloat16)    # (B, 192)
    h = jnp.maximum(
        jnp.dot(flat, fc1w_ref[...], preferred_element_type=jnp.float32)
        + fc1b_ref[...], 0.0)                               # (B, 128); cols >= 84 are 0

    # ---- fc2 (128 lanes) + ReLU + masked softmax over n_class -------------------
    logits = jnp.dot(h.astype(jnp.bfloat16), fc2w_ref[...],
                     preferred_element_type=jnp.float32) + fc2b_ref[...]
    logits = jnp.maximum(logits, 0.0)                      # (B, 128)
    col = jax.lax.broadcasted_iota(jnp.int32, logits.shape, 1)
    masked = jnp.where(col < N_CLASS, logits, -1e30)       # exclude pad lanes
    m = jnp.max(masked, axis=1, keepdims=True)
    e = jnp.exp(masked - m)
    o_ref[...] = (e / jnp.sum(e, axis=1, keepdims=True)).astype(o_ref.dtype)


def init_params(key):
    ks = jax.random.split(key, 16)

    def u(k, shape, bound):
        return jax.random.uniform(k, shape, jnp.float32, -bound, bound)

    params = {}
    cins = [C_IN, C_HID, C_HID]
    for i, cin in enumerate(cins):
        bound = 1.0 / (cin * K) ** 0.5
        w_pt = u(ks[4 * i + 0], (C_HID, cin, K), bound)          # PyTorch (Cout, Cin, K)
        b = u(ks[4 * i + 1], (C_HID,), bound)
        gamma = jnp.ones((C_HID,), jnp.float32)
        beta = jnp.zeros((C_HID,), jnp.float32)
        rmean = 0.1 * jax.random.normal(ks[4 * i + 2], (C_HID,), jnp.float32)
        rvar = 1.0 + 0.1 * jax.random.uniform(ks[4 * i + 3], (C_HID,), jnp.float32)
        scale = gamma / jnp.sqrt(rvar + BN_EPS)
        shift = beta - rmean * scale
        w_kco = jnp.transpose(w_pt, (2, 1, 0))                   # (K, Cin, Cout)
        # im2col layout for every stage: rows indexed by k*Cin + c.  bf16 weights,
        # f32 accumulation at the dot sites.
        params[f"w{i+1}"] = w_kco.reshape(K * cin, C_HID).astype(jnp.bfloat16)
        params[f"b{i+1}"] = b.reshape(1, C_HID)
        params[f"s{i+1}"] = scale.reshape(1, C_HID)
        params[f"t{i+1}"] = shift.reshape(1, C_HID)

    # fc1: PyTorch weight (84, 192); in-features are channel-major (index = c*3 + l).
    # Reorder rows to position-major (l*64 + c) to match the kernel's lane-concat of
    # the 3 pooled positions, and zero-pad out-features 84 -> 128 (lane-aligned h).
    bound = 1.0 / (P3 * C_HID) ** 0.5
    W1 = u(ks[12], (84, P3 * C_HID), bound)
    b1 = u(ks[13], (84,), bound)
    fc1w = W1.T.reshape(C_HID, P3, 84).transpose(1, 0, 2).reshape(P3 * C_HID, 84)
    params["fc1w"] = (jnp.zeros((P3 * C_HID, FC_PAD), jnp.float32)
                      .at[:, :84].set(fc1w).astype(jnp.bfloat16))
    params["fc1b"] = jnp.zeros((1, FC_PAD), jnp.float32).at[:, :84].set(b1)

    # fc2: pad contraction 84 -> 128 rows (matching h's zero pad columns) and output
    # to 128 columns (lane-dense store); the pad lanes are masked out of the softmax.
    bound = 1.0 / 84 ** 0.5
    W2 = u(ks[14], (N_CLASS, 84), bound)
    b2 = u(ks[15], (N_CLASS,), bound)
    params["fc2w"] = (jnp.zeros((FC_PAD, FC_PAD), jnp.float32)
                      .at[:84, :N_CLASS].set(W2.T).astype(jnp.bfloat16))
    params["fc2b"] = jnp.zeros((1, FC_PAD), jnp.float32).at[:, :N_CLASS].set(b2)
    return params


@jax.jit
def cnn1d_forward(x_ncw, params):
    # x_ncw: (B, 6, L) as in PyTorch.  The flatten==192 constraint requires L == 120.
    assert x_ncw.shape[0] == B and x_ncw.shape[1] == C_IN and x_ncw.shape[2] == L_IN, x_ncw.shape
    x = jnp.transpose(x_ncw, (0, 2, 1)).astype(jnp.float32)      # (B, L, C) channels-last
    x_pad = jnp.pad(x, ((0, 0), (PAD, PAD), (0, 0)))             # 'same' halo, (B, 124, 6)
    # Stage-1 im2col built once in the wrapper: (B, 120, K*Cin=30), bf16.
    x_im2col = jnp.concatenate([x_pad[:, i:i + L1, :] for i in range(K)],
                               axis=-1).astype(jnp.bfloat16)

    args = [x_im2col,
            params["w1"], params["b1"], params["s1"], params["t1"],
            params["w2"], params["b2"], params["s2"], params["t2"],
            params["w3"], params["b3"], params["s3"], params["t3"],
            params["fc1w"], params["fc1b"], params["fc2w"], params["fc2b"]]
    vmem = pl.BlockSpec(memory_space=pltpu.MemorySpace.VMEM)

    out = pl.pallas_call(
        cnn1d_kernel,
        out_shape=jax.ShapeDtypeStruct((B, FC_PAD), jnp.float32),
        in_specs=[vmem] * len(args),
        out_specs=vmem,
        scratch_shapes=[
            pltpu.VMEM((B, L1, C_HID), jnp.float32),               # y1: stage-1 conv+ReLU out
            pltpu.VMEM((B, P1 + 2 * PAD, C_HID), jnp.float32),     # pad2: padded stage-2 input
            pltpu.VMEM((B, L2, C_HID), jnp.float32),               # y2
            pltpu.VMEM((B, P2 + 2 * PAD, C_HID), jnp.float32),     # pad3
            pltpu.VMEM((B, L3, C_HID), jnp.float32),               # y3
        ],
        # TODO(synk): for realistic batch sizes (per-step work >> 0.35 us overhead),
        # add grid=(B_tiles,) with dimension_semantics=("parallel",) to shard across
        # v7x's 2 TCs, with constant index_maps on every weight so they stay resident.
    )(*args)
    return out[:, :N_CLASS]


if __name__ == "__main__":
    key = jax.random.PRNGKey(0)
    pkey, xkey = jax.random.split(key)
    params = init_params(pkey)
    x = jax.random.normal(xkey, (B, C_IN, L_IN), jnp.float32)
    out = cnn1d_forward(x, params)
    out = jax.block_until_ready(out)
    assert out.shape == (B, N_CLASS), out.shape
    assert bool(jnp.all(jnp.isfinite(out)))
    # softmax rows sum to 1 over the n_class real columns
    assert bool(jnp.allclose(jnp.sum(out, axis=1), 1.0, atol=1e-5))
    print("KERNEL_OK")
</pallas_src>

<mosaic_0001>
module attributes {stable_mosaic.version = 11 : i64} {
  func.func @cnn1d_kernel(%arg0: memref<2x120x30xbf16, #tpu.memory_space<vmem>>, %arg1: memref<30x64xbf16, #tpu.memory_space<vmem>>, %arg2: memref<1x64xf32, #tpu.memory_space<vmem>>, %arg3: memref<1x64xf32, #tpu.memory_space<vmem>>, %arg4: memref<1x64xf32, #tpu.memory_space<vmem>>, %arg5: memref<320x64xbf16, #tpu.memory_space<vmem>>, %arg6: memref<1x64xf32, #tpu.memory_space<vmem>>, %arg7: memref<1x64xf32, #tpu.memory_space<vmem>>, %arg8: memref<1x64xf32, #tpu.memory_space<vmem>>, %arg9: memref<320x64xbf16, #tpu.memory_space<vmem>>, %arg10: memref<1x64xf32, #tpu.memory_space<vmem>>, %arg11: memref<1x64xf32, #tpu.memory_space<vmem>>, %arg12: memref<1x64xf32, #tpu.memory_space<vmem>>, %arg13: memref<192x128xbf16, #tpu.memory_space<vmem>>, %arg14: memref<1x128xf32, #tpu.memory_space<vmem>>, %arg15: memref<128x128xbf16, #tpu.memory_space<vmem>>, %arg16: memref<1x128xf32, #tpu.memory_space<vmem>>, %arg17: memref<2x128xf32, #tpu.memory_space<vmem>>, %arg18: memref<2x120x64xf32, #tpu.memory_space<vmem>>, %arg19: memref<2x43x64xf32, #tpu.memory_space<vmem>>, %arg20: memref<2x39x64xf32, #tpu.memory_space<vmem>>, %arg21: memref<2x16x64xf32, #tpu.memory_space<vmem>>, %arg22: memref<2x12x64xf32, #tpu.memory_space<vmem>>) attributes {dimension_semantics = [], scalar_prefetch = 0 : i64, scratch_operands = 5 : i64, tpu.core_type = #tpu.core_type<tc>} {
    %cst = arith.constant 0.000000e+00 : f32
    %0 = vector.broadcast %cst : f32 to vector<2x2x64xf32>
    %c0 = arith.constant 0 : index
    %c0_0 = arith.constant 0 : index
    %c0_1 = arith.constant 0 : index
    %1 = vector.load %arg19[%c0, %c0_0, %c0_1] : memref<2x43x64xf32, #tpu.memory_space<vmem>>, vector<2x2x64xf32>
    tpu.vector_store %arg19[%c0, %c0_0, %c0_1], %0 {strides = array<i32>} : memref<2x43x64xf32, #tpu.memory_space<vmem>>, vector<2x2x64xf32>,
    %c0_2 = arith.constant 0 : index
    %c41 = arith.constant 41 : index
    %c0_3 = arith.constant 0 : index
    %2 = vector.load %arg19[%c0_2, %c41, %c0_3] : memref<2x43x64xf32, #tpu.memory_space<vmem>>, vector<2x2x64xf32>
    tpu.vector_store %arg19[%c0_2, %c41, %c0_3], %0 {strides = array<i32>} : memref<2x43x64xf32, #tpu.memory_space<vmem>>, vector<2x2x64xf32>,
    %c0_4 = arith.constant 0 : index
    %c0_5 = arith.constant 0 : index
    %c0_6 = arith.constant 0 : index
    %3 = vector.load %arg21[%c0_4, %c0_5, %c0_6] : memref<2x16x64xf32, #tpu.memory_space<vmem>>, vector<2x2x64xf32>
    tpu.vector_store %arg21[%c0_4, %c0_5, %c0_6], %0 {strides = array<i32>} : memref<2x16x64xf32, #tpu.memory_space<vmem>>, vector<2x2x64xf32>,
    %c0_7 = arith.constant 0 : index
    %c14 = arith.constant 14 : index
    %c0_8 = arith.constant 0 : index
    %4 = vector.load %arg21[%c0_7, %c14, %c0_8] : memref<2x16x64xf32, #tpu.memory_space<vmem>>, vector<2x2x64xf32>
    tpu.vector_store %arg21[%c0_7, %c14, %c0_8], %0 {strides = array<i32>} : memref<2x16x64xf32, #tpu.memory_space<vmem>>, vector<2x2x64xf32>,
    %c0_9 = arith.constant 0 : index
    %c0_10 = arith.constant 0 : index
    %c0_11 = arith.constant 0 : index
    %5 = vector.load %arg0[%c0_9, %c0_10, %c0_11] : memref<2x120x30xbf16, #tpu.memory_space<vmem>>, vector<2x120x30xbf16>
    %c0_12 = arith.constant 0 : index
    %c0_13 = arith.constant 0 : index
    %6 = vector.load %arg1[%c0_12, %c0_13] : memref<30x64xbf16, #tpu.memory_space<vmem>>, vector<30x64xbf16>
    %cst_14 = arith.constant dense<0.000000e+00> : vector<2x120x64xf32>
    %7 = tpu.matmul %5, %6, %cst_14 {dimension_numbers = #tpu.dot_dimension_numbers<[2], [0], [0, 1], [1], [0, 0, 0, 1, 1, 1], [], []>} : vector<2x120x30xbf16>, vector<30x64xbf16>, vector<2x120x64xf32> -> vector<2x120x64xf32>
    %c0_15 = arith.constant 0 : index
    %c0_16 = arith.constant 0 : index
    %8 = vector.load %arg2[%c0_15, %c0_16] : memref<1x64xf32, #tpu.memory_space<vmem>>, vector<1x64xf32>
    %9 = vector.shape_cast %8 : vector<1x64xf32> to vector<1x1x64xf32>
    %10 = vector.broadcast %9 : vector<1x1x64xf32> to vector<2x120x64xf32>
    %11 = arith.addf %7, %10 : vector<2x120x64xf32>
    %cst_17 = arith.constant 0.000000e+00 : f32
    %12 = vector.broadcast %cst_17 : f32 to vector<2x120x64xf32>
    %13 = arith.maximumf %11, %12 : vector<2x120x64xf32>
    %c0_18 = arith.constant 0 : index
    %c0_19 = arith.constant 0 : index
    %c0_20 = arith.constant 0 : index
    %14 = vector.load %arg18[%c0_18, %c0_19, %c0_20] : memref<2x120x64xf32, #tpu.memory_space<vmem>>, vector<2x120x64xf32>
    tpu.vector_store %arg18[%c0_18, %c0_19, %c0_20], %13 {strides = array<i32>} : memref<2x120x64xf32, #tpu.memory_space<vmem>>, vector<2x120x64xf32>,
    %c0_21 = arith.constant 0 : index
    %c0_22 = arith.constant 0 : index
    %c0_23 = arith.constant 0 : index
    %15 = tpu.strided_load %arg18[%c0_21, %c0_22, %c0_23] {strides = array<i32: 1, 3, 1>} : memref<2x120x64xf32, #tpu.memory_space<vmem>>, vector<2x39x64xf32>
    %c0_24 = arith.constant 0 : index
    %c1 = arith.constant 1 : index
    %c0_25 = arith.constant 0 : index
    %16 = tpu.strided_load %arg18[%c0_24, %c1, %c0_25] {strides = array<i32: 1, 3, 1>} : memref<2x120x64xf32, #tpu.memory_space<vmem>>, vector<2x39x64xf32>
    %17 = arith.maximumf %15, %16 : vector<2x39x64xf32>
    %c0_26 = arith.constant 0 : index
    %c2 = arith.constant 2 : index
    %c0_27 = arith.constant 0 : index
    %18 = tpu.strided_load %arg18[%c0_26, %c2, %c0_27] {strides = array<i32: 1, 3, 1>} : memref<2x120x64xf32, #tpu.memory_space<vmem>>, vector<2x39x64xf32>
    %19 = arith.maximumf %17, %18 : vector<2x39x64xf32>
    %c0_28 = arith.constant 0 : index
    %c3 = arith.constant 3 : index
    %c0_29 = arith.constant 0 : index
    %20 = tpu.strided_load %arg18[%c0_28, %c3, %c0_29] {strides = array<i32: 1, 3, 1>} : memref<2x120x64xf32, #tpu.memory_space<vmem>>, vector<2x39x64xf32>
    %21 = arith.maximumf %19, %20 : vector<2x39x64xf32>
    %c0_30 = arith.constant 0 : index
    %c4 = arith.constant 4 : index
    %c0_31 = arith.constant 0 : index
    %22 = tpu.strided_load %arg18[%c0_30, %c4, %c0_31] {strides = array<i32: 1, 3, 1>} : memref<2x120x64xf32, #tpu.memory_space<vmem>>, vector<2x39x64xf32>
    %23 = arith.maximumf %21, %22 : vector<2x39x64xf32>
    %c0_32 = arith.constant 0 : index
    %c0_33 = arith.constant 0 : index
    %24 = vector.load %arg3[%c0_32, %c0_33] : memref<1x64xf32, #tpu.memory_space<vmem>>, vector<1x64xf32>
    %25 = vector.shape_cast %24 : vector<1x64xf32> to vector<1x1x64xf32>
    %26 = vector.broadcast %25 : vector<1x1x64xf32> to vector<2x39x64xf32>
    %27 = arith.mulf %23, %26 : vector<2x39x64xf32>
    %c0_34 = arith.constant 0 : index
    %c0_35 = arith.constant 0 : index
    %28 = vector.load %arg4[%c0_34, %c0_35] : memref<1x64xf32, #tpu.memory_space<vmem>>, vector<1x64xf32>
    %29 = vector.shape_cast %28 : vector<1x64xf32> to vector<1x1x64xf32>
    %30 = vector.broadcast %29 : vector<1x1x64xf32> to vector<2x39x64xf32>
    %31 = arith.addf %27, %30 : vector<2x39x64xf32>
    %c0_36 = arith.constant 0 : index
    %c2_37 = arith.constant 2 : index
    %c0_38 = arith.constant 0 : index
    %32 = vector.load %arg19[%c0_36, %c2_37, %c0_38] : memref<2x43x64xf32, #tpu.memory_space<vmem>>, vector<2x39x64xf32>
    tpu.vector_store %arg19[%c0_36, %c2_37, %c0_38], %31 {strides = array<i32>} : memref<2x43x64xf32, #tpu.memory_space<vmem>>, vector<2x39x64xf32>,
    %c0_39 = arith.constant 0 : index
    %c0_40 = arith.constant 0 : index
    %c0_41 = arith.constant 0 : index
    %33 = vector.load %arg19[%c0_39, %c0_40, %c0_41] : memref<2x43x64xf32, #tpu.memory_space<vmem>>, vector<2x39x64xf32>
    %c0_42 = arith.constant 0 : index
    %c1_43 = arith.constant 1 : index
    %c0_44 = arith.constant 0 : index
    %34 = vector.load %arg19[%c0_42, %c1_43, %c0_44] : memref<2x43x64xf32, #tpu.memory_space<vmem>>, vector<2x39x64xf32>
    %c0_45 = arith.constant 0 : index
    %c2_46 = arith.constant 2 : index
    %c0_47 = arith.constant 0 : index
    %35 = vector.load %arg19[%c0_45, %c2_46, %c0_47] : memref<2x43x64xf32, #tpu.memory_space<vmem>>, vector<2x39x64xf32>
    %c0_48 = arith.constant 0 : index
    %c3_49 = arith.constant 3 : index
    %c0_50 = arith.constant 0 : index
    %36 = vector.load %arg19[%c0_48, %c3_49, %c0_50] : memref<2x43x64xf32, #tpu.memory_space<vmem>>, vector<2x39x64xf32>
    %c0_51 = arith.constant 0 : index
    %c4_52 = arith.constant 4 : index
    %c0_53 = arith.constant 0 : index
    %37 = vector.load %arg19[%c0_51, %c4_52, %c0_53] : memref<2x43x64xf32, #tpu.memory_space<vmem>>, vector<2x39x64xf32>
    %38 = tpu.concatenate %33, %34, %35, %36, %37 in 2 : vector<2x39x64xf32>, vector<2x39x64xf32>, vector<2x39x64xf32>, vector<2x39x64xf32>, vector<2x39x64xf32> -> vector<2x39x320xf32>
    %39 = arith.truncf %38 : vector<2x39x320xf32> to vector<2x39x320xbf16>
    %c0_54 = arith.constant 0 : index
    %c0_55 = arith.constant 0 : index
    %40 = vector.load %arg5[%c0_54, %c0_55] : memref<320x64xbf16, #tpu.memory_space<vmem>>, vector<320x64xbf16>
    %cst_56 = arith.constant dense<0.000000e+00> : vector<2x39x64xf32>
    %41 = tpu.matmul %39, %40, %cst_56 {dimension_numbers = #tpu.dot_dimension_numbers<[2], [0], [0, 1], [1], [0, 0, 0, 1, 1, 1], [], []>} : vector<2x39x320xbf16>, vector<320x64xbf16>, vector<2x39x64xf32> -> vector<2x39x64xf32>
    %c0_57 = arith.constant 0 : index
    %c0_58 = arith.constant 0 : index
    %42 = vector.load %arg6[%c0_57, %c0_58] : memref<1x64xf32, #tpu.memory_space<vmem>>, vector<1x64xf32>
    %43 = vector.shape_cast %42 : vector<1x64xf32> to vector<1x1x64xf32>
    %44 = vector.broadcast %43 : vector<1x1x64xf32> to vector<2x39x64xf32>
    %45 = arith.addf %41, %44 : vector<2x39x64xf32>
    %cst_59 = arith.constant 0.000000e+00 : f32
    %46 = vector.broadcast %cst_59 : f32 to vector<2x39x64xf32>
    %47 = arith.maximumf %45, %46 : vector<2x39x64xf32>
    %c0_60 = arith.constant 0 : index
    %c0_61 = arith.constant 0 : index
    %c0_62 = arith.constant 0 : index
    %48 = vector.load %arg20[%c0_60, %c0_61, %c0_62] : memref<2x39x64xf32, #tpu.memory_space<vmem>>, vector<2x39x64xf32>
    tpu.vector_store %arg20[%c0_60, %c0_61, %c0_62], %47 {strides = array<i32>} : memref<2x39x64xf32, #tpu.memory_space<vmem>>, vector<2x39x64xf32>,
    %c0_63 = arith.constant 0 : index
    %c0_64 = arith.constant 0 : index
    %c0_65 = arith.constant 0 : index
    %49 = tpu.strided_load %arg20[%c0_63, %c0_64, %c0_65] {strides = array<i32: 1, 3, 1>} : memref<2x39x64xf32, #tpu.memory_space<vmem>>, vector<2x12x64xf32>
    %c0_66 = arith.constant 0 : index
    %c1_67 = arith.constant 1 : index
    %c0_68 = arith.constant 0 : index
    %50 = tpu.strided_load %arg20[%c0_66, %c1_67, %c0_68] {strides = array<i32: 1, 3, 1>} : memref<2x39x64xf32, #tpu.memory_space<vmem>>, vector<2x12x64xf32>
    %51 = arith.maximumf %49, %50 : vector<2x12x64xf32>
    %c0_69 = arith.constant 0 : index
    %c2_70 = arith.constant 2 : index
    %c0_71 = arith.constant 0 : index
    %52 = tpu.strided_load %arg20[%c0_69, %c2_70, %c0_71] {strides = array<i32: 1, 3, 1>} : memref<2x39x64xf32, #tpu.memory_space<vmem>>, vector<2x12x64xf32>
    %53 = arith.maximumf %51, %52 : vector<2x12x64xf32>
    %c0_72 = arith.constant 0 : index
    %c3_73 = arith.constant 3 : index
    %c0_74 = arith.constant 0 : index
    %54 = tpu.strided_load %arg20[%c0_72, %c3_73, %c0_74] {strides = array<i32: 1, 3, 1>} : memref<2x39x64xf32, #tpu.memory_space<vmem>>, vector<2x12x64xf32>
    %55 = arith.maximumf %53, %54 : vector<2x12x64xf32>
    %c0_75 = arith.constant 0 : index
    %c4_76 = arith.constant 4 : index
    %c0_77 = arith.constant 0 : index
    %56 = tpu.strided_load %arg20[%c0_75, %c4_76, %c0_77] {strides = array<i32: 1, 3, 1>} : memref<2x39x64xf32, #tpu.memory_space<vmem>>, vector<2x12x64xf32>
    %57 = arith.maximumf %55, %56 : vector<2x12x64xf32>
    %c0_78 = arith.constant 0 : index
    %c0_79 = arith.constant 0 : index
    %58 = vector.load %arg7[%c0_78, %c0_79] : memref<1x64xf32, #tpu.memory_space<vmem>>, vector<1x64xf32>
    %59 = vector.shape_cast %58 : vector<1x64xf32> to vector<1x1x64xf32>
    %60 = vector.broadcast %59 : vector<1x1x64xf32> to vector<2x12x64xf32>
    %61 = arith.mulf %57, %60 : vector<2x12x64xf32>
    %c0_80 = arith.constant 0 : index
    %c0_81 = arith.constant 0 : index
    %62 = vector.load %arg8[%c0_80, %c0_81] : memref<1x64xf32, #tpu.memory_space<vmem>>, vector<1x64xf32>
    %63 = vector.shape_cast %62 : vector<1x64xf32> to vector<1x1x64xf32>
    %64 = vector.broadcast %63 : vector<1x1x64xf32> to vector<2x12x64xf32>
    %65 = arith.addf %61, %64 : vector<2x12x64xf32>
    %c0_82 = arith.constant 0 : index
    %c2_83 = arith.constant 2 : index
    %c0_84 = arith.constant 0 : index
    %66 = vector.load %arg21[%c0_82, %c2_83, %c0_84] : memref<2x16x64xf32, #tpu.memory_space<vmem>>, vector<2x12x64xf32>
    tpu.vector_store %arg21[%c0_82, %c2_83, %c0_84], %65 {strides = array<i32>} : memref<2x16x64xf32, #tpu.memory_space<vmem>>, vector<2x12x64xf32>,
    %c0_85 = arith.constant 0 : index
    %c0_86 = arith.constant 0 : index
    %c0_87 = arith.constant 0 : index
    %67 = vector.load %arg21[%c0_85, %c0_86, %c0_87] : memref<2x16x64xf32, #tpu.memory_space<vmem>>, vector<2x12x64xf32>
    %c0_88 = arith.constant 0 : index
    %c1_89 = arith.constant 1 : index
    %c0_90 = arith.constant 0 : index
    %68 = vector.load %arg21[%c0_88, %c1_89, %c0_90] : memref<2x16x64xf32, #tpu.memory_space<vmem>>, vector<2x12x64xf32>
    %c0_91 = arith.constant 0 : index
    %c2_92 = arith.constant 2 : index
    %c0_93 = arith.constant 0 : index
    %69 = vector.load %arg21[%c0_91, %c2_92, %c0_93] : memref<2x16x64xf32, #tpu.memory_space<vmem>>, vector<2x12x64xf32>
    %c0_94 = arith.constant 0 : index
    %c3_95 = arith.constant 3 : index
    %c0_96 = arith.constant 0 : index
    %70 = vector.load %arg21[%c0_94, %c3_95, %c0_96] : memref<2x16x64xf32, #tpu.memory_space<vmem>>, vector<2x12x64xf32>
    %c0_97 = arith.constant 0 : index
    %c4_98 = arith.constant 4 : index
    %c0_99 = arith.constant 0 : index
    %71 = vector.load %arg21[%c0_97, %c4_98, %c0_99] : memref<2x16x64xf32, #tpu.memory_space<vmem>>, vector<2x12x64xf32>
    %72 = tpu.concatenate %67, %68, %69, %70, %71 in 2 : vector<2x12x64xf32>, vector<2x12x64xf32>, vector<2x12x64xf32>, vector<2x12x64xf32>, vector<2x12x64xf32> -> vector<2x12x320xf32>
    %73 = arith.truncf %72 : vector<2x12x320xf32> to vector<2x12x320xbf16>
    %c0_100 = arith.constant 0 : index
    %c0_101 = arith.constant 0 : index
    %74 = vector.load %arg9[%c0_100, %c0_101] : memref<320x64xbf16, #tpu.memory_space<vmem>>, vector<320x64xbf16>
    %cst_102 = arith.constant dense<0.000000e+00> : vector<2x12x64xf32>
    %75 = tpu.matmul %73, %74, %cst_102 {dimension_numbers = #tpu.dot_dimension_numbers<[2], [0], [0, 1], [1], [0, 0, 0, 1, 1, 1], [], []>} : vector<2x12x320xbf16>, vector<320x64xbf16>, vector<2x12x64xf32> -> vector<2x12x64xf32>
    %c0_103 = arith.constant 0 : index
    %c0_104 = arith.constant 0 : index
    %76 = vector.load %arg10[%c0_103, %c0_104] : memref<1x64xf32, #tpu.memory_space<vmem>>, vector<1x64xf32>
    %77 = vector.shape_cast %76 : vector<1x64xf32> to vector<1x1x64xf32>
    %78 = vector.broadcast %77 : vector<1x1x64xf32> to vector<2x12x64xf32>
    %79 = arith.addf %75, %78 : vector<2x12x64xf32>
    %cst_105 = arith.constant 0.000000e+00 : f32
    %80 = vector.broadcast %cst_105 : f32 to vector<2x12x64xf32>
    %81 = arith.maximumf %79, %80 : vector<2x12x64xf32>
    %c0_106 = arith.constant 0 : index
    %c0_107 = arith.constant 0 : index
    %c0_108 = arith.constant 0 : index
    %82 = vector.load %arg22[%c0_106, %c0_107, %c0_108] : memref<2x12x64xf32, #tpu.memory_space<vmem>>, vector<2x12x64xf32>
    tpu.vector_store %arg22[%c0_106, %c0_107, %c0_108], %81 {strides = array<i32>} : memref<2x12x64xf32, #tpu.memory_space<vmem>>, vector<2x12x64xf32>,
    %c0_109 = arith.constant 0 : index
    %c0_110 = arith.constant 0 : index
    %c0_111 = arith.constant 0 : index
    %83 = tpu.strided_load %arg22[%c0_109, %c0_110, %c0_111] {strides = array<i32: 1, 3, 1>} : memref<2x12x64xf32, #tpu.memory_space<vmem>>, vector<2x3x64xf32>
    %c0_112 = arith.constant 0 : index
    %c1_113 = arith.constant 1 : index
    %c0_114 = arith.constant 0 : index
    %84 = tpu.strided_load %arg22[%c0_112, %c1_113, %c0_114] {strides = array<i32: 1, 3, 1>} : memref<2x12x64xf32, #tpu.memory_space<vmem>>, vector<2x3x64xf32>
    %85 = arith.maximumf %83, %84 : vector<2x3x64xf32>
    %c0_115 = arith.constant 0 : index
    %c2_116 = arith.constant 2 : index
    %c0_117 = arith.constant 0 : index
    %86 = tpu.strided_load %arg22[%c0_115, %c2_116, %c0_117] {strides = array<i32: 1, 3, 1>} : memref<2x12x64xf32, #tpu.memory_space<vmem>>, vector<2x3x64xf32>
    %87 = arith.maximumf %85, %86 : vector<2x3x64xf32>
    %c0_118 = arith.constant 0 : index
    %c3_119 = arith.constant 3 : index
    %c0_120 = arith.constant 0 : index
    %88 = tpu.strided_load %arg22[%c0_118, %c3_119, %c0_120] {strides = array<i32: 1, 3, 1>} : memref<2x12x64xf32, #tpu.memory_space<vmem>>, vector<2x3x64xf32>
    %89 = arith.maximumf %87, %88 : vector<2x3x64xf32>
    %c0_121 = arith.constant 0 : index
    %c4_122 = arith.constant 4 : index
    %c0_123 = arith.constant 0 : index
    %90 = tpu.strided_load %arg22[%c0_121, %c4_122, %c0_123] {strides = array<i32: 1, 3, 1>} : memref<2x12x64xf32, #tpu.memory_space<vmem>>, vector<2x3x64xf32>
    %91 = arith.maximumf %89, %90 : vector<2x3x64xf32>
    %c0_124 = arith.constant 0 : index
    %c0_125 = arith.constant 0 : index
    %92 = vector.load %arg11[%c0_124, %c0_125] : memref<1x64xf32, #tpu.memory_space<vmem>>, vector<1x64xf32>
    %93 = vector.shape_cast %92 : vector<1x64xf32> to vector<1x1x64xf32>
    %94 = vector.broadcast %93 : vector<1x1x64xf32> to vector<2x3x64xf32>
    %95 = arith.mulf %91, %94 : vector<2x3x64xf32>
    %c0_126 = arith.constant 0 : index
    %c0_127 = arith.constant 0 : index
    %96 = vector.load %arg12[%c0_126, %c0_127] : memref<1x64xf32, #tpu.memory_space<vmem>>, vector<1x64xf32>
    %97 = vector.shape_cast %96 : vector<1x64xf32> to vector<1x1x64xf32>
    %98 = vector.broadcast %97 : vector<1x1x64xf32> to vector<2x3x64xf32>
    %99 = arith.addf %95, %98 : vector<2x3x64xf32>
    %100 = vector.extract_strided_slice %99 {offsets = [0, 0, 0], sizes = [2, 1, 64], strides = [1, 1, 1]} : vector<2x3x64xf32> to vector<2x1x64xf32>
    %101 = vector.shape_cast %100 : vector<2x1x64xf32> to vector<2x64xf32>
    %102 = vector.extract_strided_slice %99 {offsets = [0, 1, 0], sizes = [2, 1, 64], strides = [1, 1, 1]} : vector<2x3x64xf32> to vector<2x1x64xf32>
    %103 = vector.shape_cast %102 : vector<2x1x64xf32> to vector<2x64xf32>
    %104 = vector.extract_strided_slice %99 {offsets = [0, 2, 0], sizes = [2, 1, 64], strides = [1, 1, 1]} : vector<2x3x64xf32> to vector<2x1x64xf32>
    %105 = vector.shape_cast %104 : vector<2x1x64xf32> to vector<2x64xf32>
    %106 = tpu.concatenate %101, %103, %105 in 1 : vector<2x64xf32>, vector<2x64xf32>, vector<2x64xf32> -> vector<2x192xf32>
    %107 = arith.truncf %106 : vector<2x192xf32> to vector<2x192xbf16>
    %c0_128 = arith.constant 0 : index
    %c0_129 = arith.constant 0 : index
    %108 = vector.load %arg13[%c0_128, %c0_129] : memref<192x128xbf16, #tpu.memory_space<vmem>>, vector<192x128xbf16>
    %cst_130 = arith.constant dense<0.000000e+00> : vector<2x128xf32>
    %109 = tpu.matmul %107, %108, %cst_130 {dimension_numbers = #tpu.dot_dimension_numbers<[1], [0], [0], [1], [0, 0, 1, 1], [], []>} : vector<2x192xbf16>, vector<192x128xbf16>, vector<2x128xf32> -> vector<2x128xf32>
    %c0_131 = arith.constant 0 : index
    %c0_132 = arith.constant 0 : index
    %110 = vector.load %arg14[%c0_131, %c0_132] : memref<1x128xf32, #tpu.memory_space<vmem>>, vector<1x128xf32>
    %111 = vector.broadcast %110 : vector<1x128xf32> to vector<2x128xf32>
    %112 = arith.addf %109, %111 : vector<2x128xf32>
    %cst_133 = arith.constant 0.000000e+00 : f32
    %113 = vector.broadcast %cst_133 : f32 to vector<2x128xf32>
    %114 = arith.maximumf %112, %113 : vector<2x128xf32>
    %115 = arith.truncf %114 : vector<2x128xf32> to vector<2x128xbf16>
    %c0_134 = arith.constant 0 : index
    %c0_135 = arith.constant 0 : index
    %116 = vector.load %arg15[%c0_134, %c0_135] : memref<128x128xbf16, #tpu.memory_space<vmem>>, vector<128x128xbf16>
    %cst_136 = arith.constant dense<0.000000e+00> : vector<2x128xf32>
    %117 = tpu.matmul %115, %116, %cst_136 {dimension_numbers = #tpu.dot_dimension_numbers<[1], [0], [0], [1], [0, 0, 1, 1], [], []>} : vector<2x128xbf16>, vector<128x128xbf16>, vector<2x128xf32> -> vector<2x128xf32>
    %c0_137 = arith.constant 0 : index
    %c0_138 = arith.constant 0 : index
    %118 = vector.load %arg16[%c0_137, %c0_138] : memref<1x128xf32, #tpu.memory_space<vmem>>, vector<1x128xf32>
    %119 = vector.broadcast %118 : vector<1x128xf32> to vector<2x128xf32>
    %120 = arith.addf %117, %119 : vector<2x128xf32>
    %cst_139 = arith.constant 0.000000e+00 : f32
    %121 = vector.broadcast %cst_139 : f32 to vector<2x128xf32>
    %122 = arith.maximumf %120, %121 : vector<2x128xf32>
    %123 = tpu.iota {dimensions = array<i32: 1>} : vector<2x128xi32>
    %c8_i32 = arith.constant 8 : i32
    %124 = vector.broadcast %c8_i32 : i32 to vector<2x128xi32>
    %125 = arith.cmpi slt, %123, %124 : vector<2x128xi32>
    %cst_140 = arith.constant -1.000000e+30 : f32
    %126 = vector.broadcast %cst_140 : f32 to vector<2x128xf32>
    %127 = arith.select %125, %122, %126 : vector<2x128xi1>, vector<2x128xf32>
    %cst_141 = arith.constant dense<0xFF800000> : vector<2xf32>
    %128 = vector.multi_reduction <maximumf>, %127, %cst_141 [1] : vector<2x128xf32> to vector<2xf32>
    %129 = vector.shape_cast %128 : vector<2xf32> to vector<2x1xf32>
    %130 = vector.broadcast %129 : vector<2x1xf32> to vector<2x128xf32>
    %131 = arith.subf %127, %130 : vector<2x128xf32>
    %132 = math.exp %131 : vector<2x128xf32>
    %cst_142 = arith.constant dense<0.000000e+00> : vector<2xf32>
    %133 = vector.multi_reduction <add>, %132, %cst_142 [1] : vector<2x128xf32> to vector<2xf32>
    %134 = vector.shape_cast %133 : vector<2xf32> to vector<2x1xf32>
    %135 = vector.broadcast %134 : vector<2x1xf32> to vector<2x128xf32>
    %136 = arith.divf %132, %135 : vector<2x128xf32>
    %c0_143 = arith.constant 0 : index
    %c0_144 = arith.constant 0 : index
    %137 = vector.load %arg17[%c0_143, %c0_144] : memref<2x128xf32, #tpu.memory_space<vmem>>, vector<2x128xf32>
    tpu.vector_store %arg17[%c0_143, %c0_144], %136 {strides = array<i32>} : memref<2x128xf32, #tpu.memory_space<vmem>>, vector<2x128xf32>,
    return
  }
}

</mosaic_0001>

<bundles_post_ra>
// kernel: cnn1d_forward.1
= control target key start
LH: loop header
LB: loop body
LE: loop exit
PB: predicated region body
PF: predicated region fallthrough
CT: control target
= control target key end

     0   :  { %s5834_s0 = inlined_call_operand.vmem [shape: bf16[2,120,30], index: 0, kind: input, shape index: {}]   ;;  %s5835_s1 = inlined_call_operand.vmem [shape: bf16[30,64], index: 1, kind: input, shape index: {}]   ;;  %s5836_s2 = inlined_call_operand.vmem [shape: f32[1,64], index: 2, kind: input, shape index: {}]   ;;  %s5837_s3 = inlined_call_operand.vmem [shape: f32[1,64], index: 3, kind: input, shape index: {}]   ;;  %s5838_s4 = inlined_call_operand.vmem [shape: f32[1,64], index: 4, kind: input, shape index: {}]   ;;  %s5839_s5 = inlined_call_operand.vmem [shape: bf16[320,64], index: 5, kind: input, shape index: {}]   ;;  %s5840_s6 = inlined_call_operand.vmem [shape: f32[1,64], index: 6, kind: input, shape index: {}]   ;;  %s5841_s7 = inlined_call_operand.vmem [shape: f32[1,64], index: 7, kind: input, shape index: {}]   ;;  %s5842_s8 = inlined_call_operand.vmem [shape: f32[1,64], index: 8, kind: input, shape index: {}]   ;;  %s5843_s9 = inlined_call_operand.vmem [shape: bf16[320,64], index: 9, kind: input, shape index: {}]   ;;  %s5844_s10 = inlined_call_operand.vmem [shape: f32[1,64], index: 10, kind: input, shape index: {}]   ;;  %s5845_s11 = inlined_call_operand.vmem [shape: f32[1,64], index: 11, kind: input, shape index: {}]   ;;  %s5846_s12 = inlined_call_operand.vmem [shape: f32[1,64], index: 12, kind: input, shape index: {}]   ;;  %s5847_s13 = inlined_call_operand.vmem [shape: bf16[192,128], index: 13, kind: input, shape index: {}]   ;;  %s5848_s14 = inlined_call_operand.vmem [shape: f32[1,128], index: 14, kind: input, shape index: {}]   ;;  %s5849_s15 = inlined_call_operand.vmem [shape: bf16[128,128], index: 15, kind: input, shape index: {}]   ;;  %s5850_s16 = inlined_call_operand.vmem [shape: f32[1,128], index: 16, kind: input, shape index: {}]   ;;  %s5851_s17 = inlined_call_operand.hbm [shape: f32[2,128], index: 17, kind: output, shape index: {}]  }
   0x1   :  { %5854 = sst [smem:[#allocation10_spill]] %s5834_s0 }
   0x2   :  { %5855 = sst [smem:[#allocation11_spill]] %s5835_s1 }
   0x3   :  { %vm240_vm0 = vcmask 1046528   ;;  %v4880_v0 = vmov 0.0   ;;  %s5856_s26 = sld [smem:[#allocation11_spill]]  ;;  %vm4881_vm1 = vmmov 0   ;;  %vm194_vm2 = vcmask 244736  }
   0x4   :  { %4576 = vmatprep.subr.bf16.mxu0 %v4880_v0  ;;  %4580 = vmatprep.mubr.msk.bf16.mxu0 %vm4881_vm1, %v4880_v0  ;;  %s5857_s30 = sld [smem:[#allocation10_spill]] }
   0x9   :  { %v4777_v1 = vld [vmem:[%s5856_s26 + $0x8] sm:$0x7f]   ;;  %v4778_v3 = vld [vmem:[%s5856_s26] sm:$0xff]  }
   0xa   :  { %v242_v2 = vsel %vm240_vm0, %v4777_v1, 0  ;;  %v4779_v4 = vld [vmem:[%s5857_s30] sm:$0xff]   ;;  %v4780_v5 = vld [vmem:[%s5857_s30 + $0x8] sm:$0xff]   ;;  %v4781_v6 = vld [vmem:[%s5857_s30 + $0x10] sm:$0xff]  }
   0xb   :  { %4577 = vmatpush3.bf16.msra.mxu0 %v242_v2  ;;  %v4782_v7 = vld [vmem:[%s5857_s30 + $0x18] sm:$0xff]   ;;  %v4783_v8 = vld [vmem:[%s5857_s30 + $0x20] sm:$0xff]   ;;  %v4784_v9 = vld [vmem:[%s5857_s30 + $0x28] sm:$0xff]  }
   0xc   :  { %4578 = vmatprep.subr.bf16.mxu0 %v4880_v0  ;;  %v4785_v10 = vld [vmem:[%s5857_s30 + $0x30] sm:$0xff]  }
   0xf   :  { %4579 = vmatpush3.bf16.msra.mxu0 %v4778_v3 }
  0x12   :  { %4581 = vmatmul.mubr.msk.bf16.vlgmr.msra.gmra.mxu0 %vm194_vm2, %v4779_v4 }
  0x13   :  { %4584 = vmatprep.mubr.msk.bf16.mxu0 %vm4881_vm1, %v4880_v0 }
  0x1a   :  { %4585 = vmatmul.mubr.msk.bf16.gmra.mxu0 %vm194_vm2, %v4780_v5 }
  0x1b   :  { %4588 = vmatprep.mubr.msk.bf16.mxu0 %vm4881_vm1, %v4880_v0 }
  0x22   :  { %4589 = vmatmul.mubr.msk.bf16.gmra.mxu0 %vm194_vm2, %v4781_v6 }
  0x23   :  { %4592 = vmatprep.mubr.msk.bf16.mxu0 %vm4881_vm1, %v4880_v0 }
  0x2a   :  { %4593 = vmatmul.mubr.msk.bf16.gmra.mxu0 %vm194_vm2, %v4782_v7 }
  0x2b   :  { %4596 = vmatprep.mubr.msk.bf16.mxu0 %vm4881_vm1, %v4880_v0 }
  0x32   :  { %4597 = vmatmul.mubr.msk.bf16.gmra.mxu0 %vm194_vm2, %v4783_v8 }
  0x33   :  { %4600 = vmatprep.mubr.msk.bf16.mxu0 %vm4881_vm1, %v4880_v0 }
  0x3a   :  { %4601 = vmatmul.mubr.msk.bf16.gmra.mxu0 %vm194_vm2, %v4784_v9 }
  0x3b   :  { %4604 = vmatprep.mubr.msk.bf16.mxu0 %vm4881_vm1, %v4880_v0 }
  0x3c   :  { %22 = vsyncpa [#allocation8], 0  ;;  %v4786_v11 = vld [vmem:[%s5857_s30 + $0x38] sm:$0xff]   ;;  %v4787_v12 = vld [vmem:[%s5857_s30 + $0x40] sm:$0xff]   ;;  %vm58_vm3 = vcmask 517120   ;;  %vm427_vm4 = vcmask 523264  }
  0x3d   :  { %v4788_v13 = vld [vmem:[%s5857_s30 + $0x48] sm:$0xff]   ;;  %v4789_v14 = vld [vmem:[%s5857_s30 + $0x50] sm:$0xff]   ;;  %v4790_v15 = vld [vmem:[%s5857_s30 + $0x58] sm:$0xff]   ;;  %59 = vst.msk [vmem:[#allocation3] sm:$0x3] %vm58_vm3, %v4880_v0  ;;  %s4882_s18 = smov 64  }
  0x3e   :  { %v4791_v16 = vld [vmem:[%s5857_s30 + $0x60] sm:$0xff]   ;;  %60 = vst.msk [vmem:[#allocation3 + $0x30] sm:$0x3] %vm58_vm3, %v4880_v0  ;;  %61 = vst.msk [vmem:[#allocation3 + $0x29] sm:$0x3] %vm58_vm3, %v4880_v0  ;;  %v4792_v17 = vld [vmem:[%s5857_s30 + $0x68] sm:$0xff]  }
  0x3f   :  { %62 = vst.msk [vmem:[#allocation3 + $0x59] sm:$0x3] %vm58_vm3, %v4880_v0  ;;  %63 = vst.msk [vmem:[#allocation5] sm:$0x3] %vm58_vm3, %v4880_v0  ;;  %v4793_v18 = vld [vmem:[%s5857_s30 + $0x70] sm:$0xff]   ;;  %vm635_vm5 = vcmask 522240  }
  0x40   :  { %64 = vst.msk [vmem:[#allocation5 + $0x10] sm:$0x3] %vm58_vm3, %v4880_v0  ;;  %65 = vst.msk [vmem:[#allocation5 + $0xe] sm:$0x3] %vm58_vm3, %v4880_v0  ;;  %v5086_v19 = vld [vmem:[%s5836_s2] ss:$0 sm:$0xff] }
  0x41   :  { %66 = vst.msk [vmem:[#allocation5 + $0x1e] sm:$0x3] %vm58_vm3, %v4880_v0  ;;  %v5104_v54 = vld [vmem:[%s5837_s3] ss:$0 sm:$0xff]  ;;  %vm3444_vm6 = vcmask 519168   ;;  %vm3994_vm7 = vcmask 1041409  }
  0x42   :  { %4605 = vmatmul.mubr.msk.bf16.gmra.mxu0 %vm194_vm2, %v4785_v10  ;;  %v5109_v59 = vld [vmem:[%s5838_s4] ss:$0 sm:$0xff]  ;;  %vm4273_vm9 = vcmask 1041408  }
  0x43   :  { %4608 = vmatprep.mubr.msk.bf16.mxu0 %vm4881_vm1, %v4880_v0 }
  0x4a   :  { %4609 = vmatmul.mubr.msk.bf16.gmra.mxu0 %vm194_vm2, %v4786_v11 }
  0x4b   :  { %4612 = vmatprep.mubr.msk.bf16.mxu0 %vm4881_vm1, %v4880_v0 }
  0x52   :  { %4613 = vmatmul.mubr.msk.bf16.gmra.mxu0 %vm194_vm2, %v4787_v12 }
  0x53   :  { %4616 = vmatprep.mubr.msk.bf16.mxu0 %vm4881_vm1, %v4880_v0 }
  0x5a   :  { %4617 = vmatmul.mubr.msk.bf16.gmra.mxu0 %vm194_vm2, %v4788_v13 }
  0x5b   :  { %4620 = vmatprep.mubr.msk.bf16.mxu0 %vm4881_vm1, %v4880_v0 }
  0x62   :  { %4621 = vmatmul.mubr.msk.bf16.gmra.mxu0 %vm194_vm2, %v4789_v14 }
  0x63   :  { %4624 = vmatprep.mubr.msk.bf16.mxu0 %vm4881_vm1, %v4880_v0 }
  0x6a   :  { %4625 = vmatmul.mubr.msk.bf16.gmra.mxu0 %vm194_vm2, %v4790_v15 }
  0x6b   :  { %4628 = vmatprep.mubr.msk.bf16.mxu0 %vm4881_vm1, %v4880_v0 }
  0x72   :  { %4629 = vmatmul.mubr.msk.bf16.gmra.mxu0 %vm194_vm2, %v4791_v16 }
  0x73   :  { %4632 = vmatprep.mubr.msk.bf16.mxu0 %vm4881_vm1, %v4880_v0 }
  0x7a   :  { %4633 = vmatmul.mubr.msk.bf16.gmra.mxu0 %vm194_vm2, %v4792_v17 }
  0x7b   :  { %4636 = vmatprep.mubr.msk.bf16.mxu0 %vm4881_vm1, %v4880_v0 }
  0x82   :  { %4637 = vmatmul.mubr.msk.bf16.gmra.mxu0 %vm194_vm2, %v4793_v18 }
  0xd2   :  { %v278_v20 = vpop.f32.mrf.mxu0 }
  0xd3   :  { %v279_v21 = vadd.f32 %v5086_v19, %v278_v20 }
  0xd4   :  { %v4582_v22 = vpop.f32.mrf.mxu0 }
  0xd5   :  { %v397_v23 = vmax.f32 %v279_v21, 0.0 }
  0xd6   :  { %v281_v24 = vpop.f32.mrf.mxu0 }
  0xd7   :  { %428 = vst.msk [vmem:[#allocation2] sm:$0xff] %vm427_vm4, %v397_v23  ;;  %v282_v25 = vadd.f32 %v5086_v19, %v281_v24 }
  0xd8   :  { %v4583_v26 = vpop.f32.mrf.mxu0 }
  0xd9   :  { %v398_v27 = vmax.f32 %v282_v25, 0.0 }
  0xda   :  { %v286_v28 = vpop.f32.mrf.mxu0 }
  0xdb   :  { %429 = vst.msk [vmem:[#allocation2 + $0x8] sm:$0xff] %vm427_vm4, %v398_v27  ;;  %v287_v29 = vadd.f32 %v5086_v19, %v286_v28 }
  0xdc   :  { %v4586_v30 = vpop.f32.mrf.mxu0 }
  0xdd   :  { %v399_v31 = vmax.f32 %v287_v29, 0.0 }
  0xde   :  { %v289_v32 = vpop.f32.mrf.mxu0 }
  0xdf   :  { %430 = vst.msk [vmem:[#allocation2 + $0x10] sm:$0xff] %vm427_vm4, %v399_v31  ;;  %v290_v33 = vadd.f32 %v5086_v19, %v289_v32  ;;  %v4794_v31 = vld [vmem:[%s5839_s5 + $0x78] sm:$0xff]  }
  0xe0   :  { %v4587_v34 = vpop.f32.mrf.mxu0  ;;  %v4795_v32 = vld [vmem:[%s5839_s5 + $0x38] sm:$0xff]   ;;  %4478 = vmatprep.subr.bf16.mxu1 %v4794_v31 }
  0xe1   :  { %v400_v35 = vmax.f32 %v290_v33, 0.0  ;;  %v4796_v33 = vld [vmem:[%s5839_s5 + $0x70] sm:$0xff]   ;;  %4479 = vmatpush3.bf16.msra.mxu1 %v4795_v32 }
  0xe2   :  { %v294_v36 = vpop.f32.mrf.mxu0  ;;  %4480 = vmatprep.subr.bf16.mxu1 %v4796_v33 }
  0xe3   :  { %431 = vst.msk [vmem:[#allocation2 + $0x18] sm:$0xff] %vm427_vm4, %v400_v35  ;;  %v295_v37 = vadd.f32 %v5086_v19, %v294_v36 }
  0xe4   :  { %v4590_v38 = vpop.f32.mrf.mxu0 }
  0xe5   :  { %v401_v39 = vmax.f32 %v295_v37, 0.0 }
  0xe6   :  { %v458_v40 = vld [vmem:[#allocation2] ss:$3 sm:$0xff]  ;;  %v478_v41 = vld [vmem:[#allocation2 + $0x1] ss:$3 sm:$0xff]  ;;  %v297_v42 = vpop.f32.mrf.mxu0  ;;  %v508_v45 = vld [vmem:[#allocation2 + $0x2] ss:$3 sm:$0xff] }
  0xe7   :  { %v497_v43 = vmax.f32 %v458_v40, %v478_v41  ;;  %432 = vst.msk [vmem:[#allocation2 + $0x20] sm:$0xff] %vm427_vm4, %v401_v39  ;;  %v298_v44 = vadd.f32 %v5086_v19, %v297_v42  ;;  %v4797_v40 = vld [vmem:[%s5839_s5 + $0x30] sm:$0xff]  }
  0xe8   :  { %v4591_v46 = vpop.f32.mrf.mxu0  ;;  %4481 = vmatpush3.bf16.msra.mxu1 %v4797_v40 }
  0xe9   :  { %v527_v47 = vmax.f32 %v497_v43, %v508_v45  ;;  %v402_v48 = vmax.f32 %v298_v44, 0.0  ;;  %v4798_v43 = vld [vmem:[%s5839_s5 + $0x68] sm:$0xff]  }
  0xea   :  { %v538_v49 = vld [vmem:[#allocation2 + $0x3] ss:$3 sm:$0xff]  ;;  %v302_v50 = vpop.f32.mrf.mxu0  ;;  %v568_v53 = vld [vmem:[#allocation2 + $0x4] ss:$3 sm:$0xff]  ;;  %4482 = vmatprep.subr.bf16.mxu1 %v4798_v43 }
  0xeb   :  { %v557_v51 = vmax.f32 %v527_v47, %v538_v49  ;;  %433 = vst.msk [vmem:[#allocation2 + $0x28] sm:$0xff] %vm427_vm4, %v402_v48  ;;  %v303_v52 = vadd.f32 %v5086_v19, %v302_v50 }
  0xec   :  { %v4594_v55 = vpop.f32.mrf.mxu0 }
  0xed   :  { %v587_v56 = vmax.f32 %v557_v51, %v568_v53  ;;  %v403_v57 = vmax.f32 %v303_v52, 0.0  ;;  %v4799_v51 = vld [vmem:[%s5839_s5 + $0x28] sm:$0xff]  }
  0xee   :  { %v305_v58 = vpop.f32.mrf.mxu0  ;;  %4483 = vmatpush3.bf16.msra.mxu1 %v4799_v51 }
  0xef   :  { %v604_v60 = vmul.f32 %v5104_v54, %v587_v56  ;;  %434 = vst.msk [vmem:[#allocation2 + $0x30] sm:$0xff] %vm427_vm4, %v403_v57  ;;  %v306_v61 = vadd.f32 %v5086_v19, %v305_v58 }
  0xf0   :  { %v4595_v62 = vpop.f32.mrf.mxu0 }
  0xf1   :  { %v404_v63 = vmax.f32 %v306_v61, 0.0  ;;  %v621_v1 = vadd.f32 %v5109_v59, %v604_v60 }
  0xf2   :  { %v460_v2 = vld [vmem:[#allocation2 + $0x18] ss:$3 sm:$0xff]  ;;  %v480_v3 = vld [vmem:[#allocation2 + $0x19] ss:$3 sm:$0xff]  ;;  %v310_v4 = vpop.f32.mrf.mxu0  ;;  %v510_v7 = vld [vmem:[#allocation2 + $0x1a] ss:$3 sm:$0xff] }
  0xf3   :  { %v498_v5 = vmax.f32 %v460_v2, %v480_v3  ;;  %435 = vst.msk [vmem:[#allocation2 + $0x38] sm:$0xff] %vm427_vm4, %v404_v63  ;;  %v311_v6 = vadd.f32 %v5086_v19, %v310_v4  ;;  %631 = vst.msk [vmem:[#allocation3 + $0x2] sm:$0xff] %vm427_vm4, %v621_v1  ;;  %v4800_v2 = vld [vmem:[%s5839_s5 + $0x60] sm:$0xff]  }
  0xf4   :  { %v4598_v8 = vpop.f32.mrf.mxu0  ;;  %v4801_v3 = vld [vmem:[%s5839_s5 + $0x20] sm:$0xff]   ;;  %4484 = vmatprep.subr.bf16.mxu1 %v4800_v2 }
  0xf5   :  { %v528_v9 = vmax.f32 %v498_v5, %v510_v7  ;;  %v405_v10 = vmax.f32 %v311_v6, 0.0  ;;  %4485 = vmatpush3.bf16.msra.mxu1 %v4801_v3 }
  0xf6   :  { %v540_v11 = vld [vmem:[#allocation2 + $0x1b] ss:$3 sm:$0xff]  ;;  %v313_v12 = vpop.f32.mrf.mxu0  ;;  %v570_v15 = vld [vmem:[#allocation2 + $0x1c] ss:$3 sm:$0xff] }
  0xf7   :  { %v558_v13 = vmax.f32 %v528_v9, %v540_v11  ;;  %436 = vst.msk [vmem:[#allocation2 + $0x40] sm:$0xff] %vm427_vm4, %v405_v10  ;;  %v314_v14 = vadd.f32 %v5086_v19, %v313_v12  ;;  %v4802_v10 = vld [vmem:[%s5839_s5 + $0x58] sm:$0xff]  }
  0xf8   :  { %v4599_v16 = vpop.f32.mrf.mxu0  ;;  %4486 = vmatprep.subr.bf16.mxu1 %v4802_v10 }
  0xf9   :  { %v588_v17 = vmax.f32 %v558_v13, %v570_v15  ;;  %v406_v18 = vmax.f32 %v314_v14, 0.0  ;;  %v4803_v13 = vld [vmem:[%s5839_s5 + $0x18] sm:$0xff]   ;;  %v4804_v14 = vld [vmem:[%s5839_s5 + $0x50] sm:$0xff]  }
  0xfa   :  { %v318_v20 = vpop.f32.mrf.mxu0  ;;  %v652_v49 = vld [vmem:[#allocation3 + $0x1] sm:$0xff]  ;;  %4487 = vmatpush3.bf16.msra.mxu1 %v4803_v13 }
  0xfb   :  { %v605_v21 = vmul.f32 %v5104_v54, %v588_v17  ;;  %437 = vst.msk [vmem:[#allocation2 + $0x48] sm:$0xff] %vm427_vm4, %v406_v18  ;;  %v319_v22 = vadd.f32 %v5086_v19, %v318_v20  ;;  %4488 = vmatprep.subr.bf16.mxu1 %v4804_v14 }
  0xfc   :  { %v4602_v23 = vpop.f32.mrf.mxu0 }
  0xfd   :  { %v407_v24 = vmax.f32 %v319_v22, 0.0  ;;  %v622_v25 = vadd.f32 %v5109_v59, %v605_v21  ;;  %v4805_v23 = vld [vmem:[%s5839_s5 + $0x10] sm:$0xff]  }
  0xfe   :  { %v462_v26 = vld [vmem:[#allocation2 + $0x30] ss:$3 sm:$0xff]  ;;  %v482_v27 = vld [vmem:[#allocation2 + $0x31] ss:$3 sm:$0xff]  ;;  %v321_v28 = vpop.f32.mrf.mxu0  ;;  %v512_v34 = vld [vmem:[#allocation2 + $0x32] ss:$3 sm:$0xff]  ;;  %4489 = vmatpush3.bf16.msra.mxu1 %v4805_v23 }
  0xff   :  { %v499_v29 = vmax.f32 %v462_v26, %v482_v27  ;;  %438 = vst.msk [vmem:[#allocation2 + $0x50] sm:$0xff] %vm427_vm4, %v407_v24  ;;  %v322_v30 = vadd.f32 %v5086_v19, %v321_v28  ;;  %632 = vst.msk [vmem:[#allocation3 + $0xa] sm:$0xff] %vm427_vm4, %v622_v25 }
 0x100   :  { %v4603_v35 = vpop.f32.mrf.mxu0 }
 0x101   :  { %v529_v36 = vmax.f32 %v499_v29, %v512_v34  ;;  %v408_v37 = vmax.f32 %v322_v30, 0.0 }
 0x102   :  { %v542_v38 = vld [vmem:[#allocation2 + $0x33] ss:$3 sm:$0xff]  ;;  %v326_v39 = vpop.f32.mrf.mxu0  ;;  %v572_v44 = vld [vmem:[#allocation2 + $0x34] ss:$3 sm:$0xff] }
 0x103   :  { %v559_v41 = vmax.f32 %v529_v36, %v542_v38  ;;  %439 = vst.msk [vmem:[#allocation2 + $0x58] sm:$0xff] %vm427_vm4, %v408_v37  ;;  %v327_v42 = vadd.f32 %v5086_v19, %v326_v39  ;;  %v4806_v37 = vld [vmem:[%s5839_s5 + $0x48] sm:$0xff]  }
 0x104   :  { %v4606_v45 = vpop.f32.mrf.mxu0  ;;  %v4807_v38 = vld [vmem:[%s5839_s5 + $0x8] sm:$0xff]   ;;  %4490 = vmatprep.subr.bf16.mxu1 %v4806_v37 }
 0x105   :  { %v589_v46 = vmax.f32 %v559_v41, %v572_v44  ;;  %v409_v47 = vmax.f32 %v327_v42, 0.0  ;;  %v4808_v41 = vld [vmem:[%s5839_s5 + $0x40] sm:$0xff]   ;;  %4491 = vmatpush3.bf16.msra.mxu1 %v4807_v38 }
 0x106   :  { %v329_v48 = vpop.f32.mrf.mxu0  ;;  %v653_v50 = vld [vmem:[#allocation3 + $0x9] sm:$0xff]  ;;  %4492 = vmatprep.subr.bf16.mxu1 %v4808_v41 }
 0x107   :  { %v606_v52 = vmul.f32 %v5104_v54, %v589_v46  ;;  %440 = vst.msk [vmem:[#allocation2 + $0x60] sm:$0xff] %vm427_vm4, %v409_v47  ;;  %v330_v53 = vadd.f32 %v5086_v19, %v329_v48  ;;  %v4707_v55 = vpack.i.bf16 %v653_v50, %v652_v49  ;;  %v672_v21 = vld [vmem:[#allocation3 + $0x3] sm:$0xff]  ;;  %v4809_v46 = vld [vmem:[%s5839_s5] sm:$0xff]  }
 0x108   :  { %v4607_v56 = vpop.f32.mrf.mxu0 }
 0x109   :  { %v410_v57 = vmax.f32 %v330_v53, 0.0  ;;  %4708 = vrot.lane.b32.xlu0 %v4707_v55, %s4882_s18  ;;  %v623_v58 = vadd.f32 %v5109_v59, %v606_v52  ;;  %4493 = vmatpush3.bf16.msra.mxu1 %v4809_v46 }
 0x10a   :  { %v464_v60 = vld [vmem:[#allocation2 + $0x48] ss:$3 sm:$0xff]  ;;  %v484_v61 = vld [vmem:[#allocation2 + $0x49] ss:$3 sm:$0xff]  ;;  %v334_v62 = vpop.f32.mrf.mxu0  ;;  %v514_v4 = vld [vmem:[#allocation2 + $0x4a] ss:$3 sm:$0xff]  ;;  %4640 = vmatprep.subr.bf16.mxu1 %v4880_v0 }
 0x10b   :  { %v500_v63 = vmax.f32 %v464_v60, %v484_v61  ;;  %441 = vst.msk [vmem:[#allocation2 + $0x68] sm:$0xff] %vm427_vm4, %v410_v57  ;;  %v335_v1 = vadd.f32 %v5086_v19, %v334_v62  ;;  %633 = vst.msk [vmem:[#allocation3 + $0x12] sm:$0xff] %vm427_vm4, %v623_v58 }
 0x10c   :  { %v4610_v5 = vpop.f32.mrf.mxu0 }
 0x10d   :  { %v530_v6 = vmax.f32 %v500_v63, %v514_v4  ;;  %v411_v7 = vmax.f32 %v335_v1, 0.0 }
 0x10e   :  { %v544_v8 = vld [vmem:[#allocation2 + $0x4b] ss:$3 sm:$0xff]  ;;  %v337_v9 = vpop.f32.mrf.mxu0  ;;  %v574_v15 = vld [vmem:[#allocation2 + $0x4c] ss:$3 sm:$0xff] }
 0x10f   :  { %v560_v11 = vmax.f32 %v530_v6, %v544_v8  ;;  %442 = vst.msk [vmem:[#allocation2 + $0x70] sm:$0xff] %vm427_vm4, %v411_v7  ;;  %v338_v12 = vadd.f32 %v5086_v19, %v337_v9 }
 0x110   :  { %v4611_v16 = vpop.f32.mrf.mxu0 }
 0x111   :  { %v590_v17 = vmax.f32 %v560_v11, %v574_v15  ;;  %v412_v18 = vmax.f32 %v338_v12, 0.0 }
 0x112   :  { %v342_v20 = vpop.f32.mrf.mxu0  ;;  %v673_v22 = vld [vmem:[#allocation3 + $0xb] sm:$0xff] }
 0x113   :  { %v607_v24 = vmul.f32 %v5104_v54, %v590_v17  ;;  %443 = vst.msk [vmem:[#allocation2 + $0x78] sm:$0xff] %vm427_vm4, %v412_v18  ;;  %v343_v25 = vadd.f32 %v5086_v19, %v342_v20  ;;  %v4712_v26 = vpack.i.bf16 %v673_v22, %v672_v21  ;;  %v654_v52 = vld [vmem:[#allocation3 + $0x11] sm:$0xff] }
 0x114   :  { %v4614_v27 = vpop.f32.mrf.mxu0 }
 0x115   :  { %v413_v28 = vmax.f32 %v343_v25, 0.0  ;;  %4713 = vrot.lane.b32.xlu0 %v4712_v26, %s4882_s18  ;;  %v624_v29 = vadd.f32 %v5109_v59, %v607_v24 }
 0x116   :  { %v466_v30 = vld [vmem:[#allocation2 + $0x60] ss:$3 sm:$0x7f]  ;;  %v486_v31 = vld [vmem:[#allocation2 + $0x61] ss:$3 sm:$0x7f]  ;;  %v345_v32 = vpop.f32.mrf.mxu0 }
 0x117   :  { %v501_v33 = vmax.f32 %v466_v30, %v486_v31  ;;  %444 = vst.msk [vmem:[#allocation2 + $0x80] sm:$0xff] %vm427_vm4, %v413_v28  ;;  %v346_v34 = vadd.f32 %v5086_v19, %v345_v32  ;;  %634 = vst.msk [vmem:[#allocation3 + $0x1a] sm:$0xff] %vm427_vm4, %v624_v29  ;;  %v516_v35 = vld [vmem:[#allocation2 + $0x62] ss:$3 sm:$0x7f] }
 0x118   :  { %v4615_v36 = vpop.f32.mrf.mxu0  ;;  %v546_v42 = vld [vmem:[#allocation2 + $0x63] ss:$3 sm:$0x7f]  ;;  %v576_v47 = vld [vmem:[#allocation2 + $0x64] ss:$3 sm:$0x7f] }
 0x119   :  { %v531_v39 = vmax.f32 %v501_v33, %v516_v35  ;;  %v414_v40 = vmax.f32 %v346_v34, 0.0 }
 0x11a   :  { %v350_v43 = vpop.f32.mrf.mxu0 }
 0x11b   :  { %v561_v44 = vmax.f32 %v531_v39, %v546_v42  ;;  %445 = vst.msk [vmem:[#allocation2 + $0x88] sm:$0xff] %vm427_vm4, %v414_v40  ;;  %v351_v45 = vadd.f32 %v5086_v19, %v350_v43 }
 0x11c   :  { %v4618_v48 = vpop.f32.mrf.mxu0 }
 0x11d   :  { %v591_v49 = vmax.f32 %v561_v44, %v576_v47  ;;  %v415_v50 = vmax.f32 %v351_v45, 0.0 }
 0x11e   :  { %v353_v51 = vpop.f32.mrf.mxu0  ;;  %v655_v53 = vld [vmem:[#allocation3 + $0x19] sm:$0xff] }
 0x11f   :  { %v608_v55 = vmul.f32 %v5104_v54, %v591_v49  ;;  %446 = vst.msk [vmem:[#allocation2 + $0x90] sm:$0xff] %vm427_vm4, %v415_v50  ;;  %v354_v56 = vadd.f32 %v5086_v19, %v353_v51  ;;  %v4717_v57 = vpack.i.bf16 %v655_v53, %v654_v52  ;;  %v674_v17 = vld [vmem:[#allocation3 + $0x13] sm:$0xff] }
 0x120   :  { %v4619_v58 = vpop.f32.mrf.mxu0 }
 0x121   :  { %v416_v60 = vmax.f32 %v354_v56, 0.0  ;;  %4718 = vrot.lane.b32.xlu1 %v4717_v57, %s4882_s18  ;;  %v625_v61 = vadd.f32 %v5109_v59, %v608_v55 }
 0x122   :  { %v468_v62 = vld [vmem:[#allocation2 + $0x78] ss:$3 sm:$0xff]  ;;  %v488_v63 = vld [vmem:[#allocation2 + $0x79] ss:$3 sm:$0xff]  ;;  %v358_v1 = vpop.f32.mrf.mxu0  ;;  %v518_v4 = vld [vmem:[#allocation2 + $0x7a] ss:$3 sm:$0xff] }
 0x123   :  { %v502_v2 = vmax.f32 %v468_v62, %v488_v63  ;;  %447 = vst.msk [vmem:[#allocation2 + $0x98] sm:$0xff] %vm427_vm4, %v416_v60  ;;  %v359_v3 = vadd.f32 %v5086_v19, %v358_v1 }
 0x124   :  { %636 = vst.msk [vmem:[#allocation3 + $0x22] sm:$0x7f] %vm635_vm5, %v625_v61  ;;  %v4622_v5 = vpop.f32.mrf.mxu0 }
 0x125   :  { %v532_v6 = vmax.f32 %v502_v2, %v518_v4  ;;  %v417_v7 = vmax.f32 %v359_v3, 0.0 }
 0x126   :  { %v548_v8 = vld [vmem:[#allocation2 + $0x7b] ss:$3 sm:$0xff]  ;;  %v361_v9 = vpop.f32.mrf.mxu0  ;;  %v578_v12 = vld [vmem:[#allocation2 + $0x7c] ss:$3 sm:$0xff] }
 0x127   :  { %v562_v10 = vmax.f32 %v532_v6, %v548_v8  ;;  %448 = vst.msk [vmem:[#allocation2 + $0xa0] sm:$0xff] %vm427_vm4, %v417_v7  ;;  %v362_v11 = vadd.f32 %v5086_v19, %v361_v9 }
 0x128   :  { %v4623_v13 = vpop.f32.mrf.mxu0 }
 0x129   :  { %v592_v14 = vmax.f32 %v562_v10, %v578_v12  ;;  %v418_v15 = vmax.f32 %v362_v11, 0.0 }
 0x12a   :  { %v366_v16 = vpop.f32.mrf.mxu0 }
 0x12b   :  { %v675_v18 = vld [vmem:[#allocation3 + $0x1b] sm:$0xff]  ;;  %v609_v20 = vmul.f32 %v5104_v54, %v592_v14  ;;  %449 = vst.msk [vmem:[#allocation2 + $0xa8] sm:$0xff] %vm427_vm4, %v418_v15  ;;  %v367_v21 = vadd.f32 %v5086_v19, %v366_v16  ;;  %v676_v25 = vld [vmem:[#allocation3 + $0x23] sm:$0x7f] }
 0x12c   :  { %v4722_v22 = vpack.i.bf16 %v675_v18, %v674_v17  ;;  %v4626_v23 = vpop.f32.mrf.mxu0  ;;  %v656_v24 = vld [vmem:[#allocation3 + $0x21] sm:$0x7f] }
 0x12d   :  { %v419_v26 = vmax.f32 %v367_v21, 0.0  ;;  %v626_v27 = vadd.f32 %v5109_v59, %v609_v20  ;;  %v4727_v33 = vpack.i.bf16 %v676_v25, %v656_v24 }
 0x12e   :  { %4723 = vrot.lane.b32.xlu1 %v4722_v22, %s4882_s18  ;;  %v470_v28 = vld [vmem:[#allocation2 + $0x90] ss:$3 sm:$0xff]  ;;  %v490_v29 = vld [vmem:[#allocation2 + $0x91] ss:$3 sm:$0xff]  ;;  %v369_v30 = vpop.f32.mrf.mxu0  ;;  %v520_v34 = vld [vmem:[#allocation2 + $0x92] ss:$3 sm:$0xff] }
 0x12f   :  { %v503_v31 = vmax.f32 %v470_v28, %v490_v29  ;;  %450 = vst.msk [vmem:[#allocation2 + $0xb0] sm:$0xff] %vm427_vm4, %v419_v26  ;;  %v370_v32 = vadd.f32 %v5086_v19, %v369_v30  ;;  %637 = vst.msk [vmem:[#allocation3 + $0x32] sm:$0xff] %vm427_vm4, %v626_v27 }
 0x130   :  { %v4627_v35 = vpop.f32.mrf.mxu0 }
 0x131   :  { %v533_v36 = vmax.f32 %v503_v31, %v520_v34  ;;  %v420_v37 = vmax.f32 %v370_v32, 0.0 }
 0x132   :  { %4728 = vrot.lane.b32.xlu1 %v4727_v33, %s4882_s18  ;;  %v550_v38 = vld [vmem:[#allocation2 + $0x93] ss:$3 sm:$0xff]  ;;  %v374_v39 = vpop.f32.mrf.mxu0  ;;  %v580_v42 = vld [vmem:[#allocation2 + $0x94] ss:$3 sm:$0xff] }
 0x133   :  { %v563_v40 = vmax.f32 %v533_v36, %v550_v38  ;;  %451 = vst.msk [vmem:[#allocation2 + $0xb8] sm:$0xff] %vm427_vm4, %v420_v37  ;;  %v375_v41 = vadd.f32 %v5086_v19, %v374_v39 }
 0x134   :  { %v4630_v43 = vpop.f32.mrf.mxu0 }
 0x135   :  { %v593_v44 = vmax.f32 %v563_v40, %v580_v42  ;;  %v421_v45 = vmax.f32 %v375_v41, 0.0 }
 0x136   :  { %v377_v46 = vpop.f32.mrf.mxu0  ;;  %v657_v9 = vld [vmem:[#allocation3 + $0x31] sm:$0xff] }
 0x137   :  { %v610_v47 = vmul.f32 %v5104_v54, %v593_v44  ;;  %452 = vst.msk [vmem:[#allocation2 + $0xc0] sm:$0xff] %vm427_vm4, %v421_v45  ;;  %v378_v48 = vadd.f32 %v5086_v19, %v377_v46 }
 0x138   :  { %v4631_v49 = vpop.f32.mrf.mxu0 }
 0x139   :  { %v422_v50 = vmax.f32 %v378_v48, 0.0  ;;  %v627_v51 = vadd.f32 %v5109_v59, %v610_v47 }
 0x13a   :  { %v472_v52 = vld [vmem:[#allocation2 + $0xa8] ss:$3 sm:$0xff]  ;;  %v492_v53 = vld [vmem:[#allocation2 + $0xa9] ss:$3 sm:$0xff]  ;;  %v382_v55 = vpop.f32.mrf.mxu0  ;;  %v522_v58 = vld [vmem:[#allocation2 + $0xaa] ss:$3 sm:$0xff] }
 0x13b   :  { %v504_v56 = vmax.f32 %v472_v52, %v492_v53  ;;  %453 = vst.msk [vmem:[#allocation2 + $0xc8] sm:$0xff] %vm427_vm4, %v422_v50  ;;  %v383_v57 = vadd.f32 %v5086_v19, %v382_v55  ;;  %638 = vst.msk [vmem:[#allocation3 + $0x3a] sm:$0xff] %vm427_vm4, %v627_v51 }
 0x13c   :  { %v4634_v60 = vpop.f32.mrf.mxu0 }
 0x13d   :  { %v534_v61 = vmax.f32 %v504_v56, %v522_v58  ;;  %v423_v62 = vmax.f32 %v383_v57, 0.0  ;;  %v4883_v56 = vmov 1966171168  }
 0x13e   :  { %v552_v63 = vld [vmem:[#allocation2 + $0xab] ss:$3 sm:$0xff]  ;;  %v385_v1 = vpop.f32.mrf.mxu0  ;;  %v582_v4 = vld [vmem:[#allocation2 + $0xac] ss:$3 sm:$0xff]  ;;  %v878_v57 = vunpack.c.l.s4 %v4883_v56 }
 0x13f   :  { %v564_v2 = vmax.f32 %v534_v61, %v552_v63  ;;  %454 = vst.msk [vmem:[#allocation2 + $0xd0] sm:$0xff] %vm427_vm4, %v423_v62  ;;  %v386_v3 = vadd.f32 %v5086_v19, %v385_v1  ;;  %v683_v63 = vld [vmem:[#allocation3 + $0xc] sm:$0xff]  ;;  %v4811_v56 = vld [vmem:[%s5839_s5 + $0x90] sm:$0xff]  }
 0x140   :  { %v4635_v5 = vpop.f32.mrf.mxu0  ;;  %v879_v60 = vunpack.c.0.s8 %v878_v57  ;;  %v644_v57 = vld [vmem:[#allocation3 + $0x10] sm:$0xff] }
 0x141   :  { %v594_v6 = vmax.f32 %v564_v2, %v582_v4  ;;  %v424_v7 = vmax.f32 %v386_v3, 0.0  ;;  %v642_v2 = vld [vmem:[#allocation3] sm:$0xff] }
 0x142   :  { %v390_v8 = vpop.f32.mrf.mxu0  ;;  %v677_v10 = vld [vmem:[#allocation3 + $0x33] sm:$0xff]  ;;  %v682_v3 = vld [vmem:[#allocation3 + $0x4] sm:$0xff] }
 0x143   :  { %v611_v11 = vmul.f32 %v5104_v54, %v594_v6  ;;  %455 = vst.msk [vmem:[#allocation2 + $0xd8] sm:$0xff] %vm427_vm4, %v424_v7  ;;  %v391_v12 = vadd.f32 %v5086_v19, %v390_v8  ;;  %v4732_v13 = vpack.i.bf16 %v677_v10, %v657_v9  ;;  %v658_v31 = vld [vmem:[#allocation3 + $0x39] sm:$0xff]  ;;  %v643_v6 = vld [vmem:[#allocation3 + $0x8] sm:$0xff]  ;;  %v794_v9 = vpack.c.bf16 %v683_v63, %v682_v3 }
 0x144   :  { %v4638_v14 = vpop.f32.mrf.mxu0  ;;  %v662_v7 = vld [vmem:[#allocation3 + $0x2] sm:$0xff]  ;;  %v663_v8 = vld [vmem:[#allocation3 + $0xa] sm:$0xff]  ;;  %v4338_v10 = vpack.c.bf16 %v683_v63, %v683_v63  ;;  %v664_v63 = vld [vmem:[#allocation3 + $0x12] sm:$0xff] }
 0x145   :  { %v425_v15 = vmax.f32 %v391_v12, 0.0  ;;  %4733 = vrot.lane.b32.xlu0 %v4732_v13, %s4882_s18  ;;  %v628_v16 = vadd.f32 %v5109_v59, %v611_v11 }
 0x146   :  { %v474_v17 = vld [vmem:[#allocation2 + $0xc0] ss:$3 sm:$0xff]  ;;  %v494_v18 = vld [vmem:[#allocation2 + $0xc1] ss:$3 sm:$0xff]  ;;  %v393_v20 = vpop.f32.mrf.mxu0  ;;  %v524_v23 = vld [vmem:[#allocation2 + $0xc2] ss:$3 sm:$0xff] }
 0x147   :  { %v505_v21 = vmax.f32 %v474_v17, %v494_v18  ;;  %456 = vst.msk [vmem:[#allocation2 + $0xe0] sm:$0xff] %vm427_vm4, %v425_v15  ;;  %v394_v22 = vadd.f32 %v5086_v19, %v393_v20  ;;  %639 = vst.msk [vmem:[#allocation3 + $0x42] sm:$0xff] %vm427_vm4, %v628_v16 }
 0x148   :  { %v4639_v24 = vpop.f32.mrf.mxu0 }
 0x149   :  { %v535_v25 = vmax.f32 %v505_v21, %v524_v23  ;;  %v426_v26 = vmax.f32 %v394_v22, 0.0 }
 0x14a   :  { %v554_v27 = vld [vmem:[#allocation2 + $0xc3] ss:$3 sm:$0xff]  ;;  %v584_v29 = vld [vmem:[#allocation2 + $0xc4] ss:$3 sm:$0xff] }
 0x14b   :  { %v565_v28 = vmax.f32 %v535_v25, %v554_v27  ;;  %457 = vst.msk [vmem:[#allocation2 + $0xe8] sm:$0xff] %vm427_vm4, %v426_v26 }
 0x14d   :  { %v595_v30 = vmax.f32 %v565_v28, %v584_v29 }
 0x14e   :  { %v678_v32 = vld [vmem:[#allocation3 + $0x3b] sm:$0xff] }
 0x14f   :  { %v612_v33 = vmul.f32 %v5104_v54, %v595_v30  ;;  %v4737_v34 = vpack.i.bf16 %v678_v32, %v658_v31  ;;  %v659_v44 = vld [vmem:[#allocation3 + $0x41] sm:$0xff] }
 0x151   :  { %4738 = vrot.lane.b32.xlu0 %v4737_v34, %s4882_s18  ;;  %v629_v19 = vadd.f32 %v5109_v59, %v612_v33 }
 0x152   :  { %v476_v35 = vld [vmem:[#allocation2 + $0xd8] ss:$3 sm:$0x7f]  ;;  %v496_v36 = vld [vmem:[#allocation2 + $0xd9] ss:$3 sm:$0x7f] }
 0x153   :  { %v506_v37 = vmax.f32 %v476_v35, %v496_v36  ;;  %640 = vst.msk [vmem:[#allocation3 + $0x4a] sm:$0xff] %vm427_vm4, %v629_v19  ;;  %v526_v38 = vld [vmem:[#allocation2 + $0xda] ss:$3 sm:$0x7f] }
 0x154   :  { %v556_v40 = vld [vmem:[#allocation2 + $0xdb] ss:$3 sm:$0x7f]  ;;  %v586_v42 = vld [vmem:[#allocation2 + $0xdc] ss:$3 sm:$0x7f] }
 0x155   :  { %v536_v39 = vmax.f32 %v506_v37, %v526_v38 }
 0x157   :  { %v566_v41 = vmax.f32 %v536_v39, %v556_v40 }
 0x159   :  { %v596_v43 = vmax.f32 %v566_v41, %v586_v42 }
 0x15a   :  { %v679_v45 = vld [vmem:[#allocation3 + $0x43] sm:$0xff] }
 0x15b   :  { %v613_v46 = vmul.f32 %v5104_v54, %v596_v43  ;;  %v4742_v47 = vpack.i.bf16 %v679_v45, %v659_v44  ;;  %v660_v49 = vld [vmem:[#allocation3 + $0x49] sm:$0xff]  ;;  %v880_v54 = vlaneseq }
 0x15d   :  { %4743 = vrot.lane.b32.xlu1 %v4742_v47, %s4882_s18  ;;  %v630_v48 = vadd.f32 %v5109_v59, %v613_v46  ;;  %v5248_v61 = vshrl.u32 %v880_v54, 7 }
 0x15f   :  { %641 = vst.msk [vmem:[#allocation3 + $0x52] sm:$0x7f] %vm635_vm5, %v630_v48  ;;  %v5251_v11 = vsub.s32 %v879_v60, %v5248_v61 }
 0x161   :  { %v897_v18 = vrot.slane %v794_v9, %v5251_v11  ;;  %v904_v20 = vrot.slane %v4338_v10, %v5251_v11  ;;  %v4812_v10 = vld [vmem:[%s5839_s5 + $0x88] sm:$0xff]  }
 0x166   :  { %v661_v50 = vld [vmem:[#allocation3 + $0x51] sm:$0x7f] }
 0x167   :  { %v681_v51 = vld [vmem:[#allocation3 + $0x53] sm:$0x7f]  ;;  %v680_v52 = vld [vmem:[#allocation3 + $0x4b] sm:$0xff] }
 0x168   :  { %v4752_v53 = vpack.i.bf16 %v681_v51, %v661_v50  ;;  %v4747_v55 = vpack.i.bf16 %v680_v52, %v660_v49  ;;  %v4810_v50 = vld [vmem:[%s5839_s5 + $0x98] sm:$0xff]  }
 0x16a   :  { %4753 = vrot.lane.b32.xlu1 %v4752_v53, %s4882_s18  ;;  %4748 = vrot.lane.b32.xlu0 %v4747_v55, %s4882_s18  ;;  %v685_v53 = vld [vmem:[#allocation3 + $0x1c] sm:$0xff] }
 0x16b   :  { %v4341_v3 = vpack.c.bf16 %v685_v53, %v685_v53 }
 0x17b   :  { %v4709_v58 = vpop.permute.xlu0 %4708 }
 0x17c   :  { %v4711_v59 = vunpack.i.h.bf16 %v4709_v58  ;;  %v4710_v62 = vunpack.i.l.bf16 %v4709_v58  ;;  %v684_v58 = vld [vmem:[#allocation3 + $0x14] sm:$0xff] }
 0x17e   :  { %v773_v12 = vsel %vm427_vm4, %v643_v6, %v4711_v59  ;;  %v772_v13 = vsel %vm427_vm4, %v642_v2, %v4710_v62  ;;  %v645_v62 = vld [vmem:[#allocation3 + $0x18] sm:$0xff]  ;;  %v797_v2 = vpack.c.bf16 %v685_v53, %v684_v58 }
 0x17f   :  { %v688_v58 = vld [vmem:[#allocation3 + $0x3c] sm:$0xff] }
 0x187   :  { %v4714_v1 = vpop.permute.xlu0 %4713 }
 0x188   :  { %v4716_v4 = vunpack.i.h.bf16 %v4714_v1  ;;  %v4715_v5 = vunpack.i.l.bf16 %v4714_v1  ;;  %v665_v1 = vld [vmem:[#allocation3 + $0x1a] sm:$0xff] }
 0x18a   :  { %v783_v14 = vsel %vm427_vm4, %v663_v8, %v4716_v4  ;;  %v782_v15 = vsel %vm427_vm4, %v662_v7, %v4715_v5 }
 0x18b   :  { %v4336_v16 = vpack.c.bf16 %v782_v15, %v772_v13  ;;  %v4337_v17 = vpack.c.bf16 %v783_v14, %v773_v12  ;;  %v964_v12 = vrot.slane %v797_v2, %v5251_v11  ;;  %v971_v13 = vrot.slane %v4341_v3, %v5251_v11  ;;  %v647_v3 = vld [vmem:[#allocation3 + $0x30] sm:$0xff] }
 0x18d   :  { %v883_v21 = vrot.slane %v4336_v16, %v5251_v11  ;;  %v890_v22 = vrot.slane %v4337_v17, %v5251_v11 }
 0x18f   :  { %v905_v23 = vcombine.low %v883_v21, %v897_v18  ;;  %v906_v24 = vcombine.high %v883_v21, %v897_v18  ;;  %v907_v25 = vcombine.low %v890_v22, %v904_v20  ;;  %v908_v26 = vcombine.high %v890_v22, %v904_v20  ;;  %v4813_v21 = vld [vmem:[%s5839_s5 + $0x80] sm:$0xff]  }
 0x191   :  { %v915_v27 = vrot.slane %v905_v23, %v5251_v11  ;;  %v922_v28 = vrot.slane %v907_v25, %v5251_v11  ;;  %v929_v29 = vrot.slane %v906_v24, %v5251_v11  ;;  %v936_v30 = vrot.slane %v908_v26, %v5251_v11 }
 0x193   :  { %v1374_v31 = vcombine.low %v915_v27, %v929_v29  ;;  %v4370_v32 = vcombine.high %v915_v27, %v929_v29  ;;  %v1376_v33 = vcombine.low %v922_v28, %v936_v30  ;;  %v4371_v34 = vcombine.high %v922_v28, %v936_v30  ;;  %v4719_v46 = vpop.permute.xlu1 %4718 }
 0x194   :  { %v4721_v51 = vunpack.i.h.bf16 %v4719_v46  ;;  %v4720_v52 = vunpack.i.l.bf16 %v4719_v46 }
 0x195   :  { %v1384_v19 = vrot.slane %v1374_v31, %v5251_v11  ;;  %v1391_v35 = vrot.slane %v4370_v32, %v5251_v11  ;;  %v1398_v36 = vrot.slane %v1376_v33, %v5251_v11  ;;  %v1405_v37 = vrot.slane %v4371_v34, %v5251_v11 }
 0x196   :  { %v774_v4 = vsel %vm427_vm4, %v644_v57, %v4720_v52  ;;  %v775_v5 = vsel %vm427_vm4, %v645_v62, %v4721_v51  ;;  %v686_v51 = vld [vmem:[#allocation3 + $0x24] sm:$0x7f]  ;;  %v687_v62 = vld [vmem:[#allocation3 + $0x34] sm:$0xff] }
 0x197   :  { %v1407_v38 = vcombine.high %v1384_v19, %v1391_v35  ;;  %v1409_v39 = vcombine.high %v1398_v36, %v1405_v37  ;;  %v1406_v40 = vcombine.low %v1384_v19, %v1391_v35  ;;  %v1408_v41 = vcombine.low %v1398_v36, %v1405_v37  ;;  %v646_v36 = vld [vmem:[#allocation3 + $0x20] sm:$0x7f] }
 0x198   :  { %v666_v37 = vld [vmem:[#allocation3 + $0x22] sm:$0x7f]  ;;  %v800_v57 = vpack.c.bf16 %v686_v51, %v686_v51 }
 0x199   :  { %v1423_v42 = vrot.slane %v1407_v38, %v5251_v11  ;;  %v1437_v43 = vrot.slane %v1409_v39, %v5251_v11  ;;  %v5272_v44 = vrot.slane %v1406_v40, %v5251_v11  ;;  %v5275_v45 = vrot.slane %v1408_v41, %v5251_v11 }
 0x19a   :  { %v1022_v2 = vrot.slane %v800_v57, %v5251_v11 }
 0x19b   :  { %v1440_v47 = vcombine.low %v1423_v42, %v1437_v43  ;;  %v1438_v48 = vcombine.low %v5272_v44, %v5275_v45  ;;  %v1439_v49 = vcombine.high %v5272_v44, %v5275_v45 }
 0x19d   :  { %2012 = vmatprep.mubr.bf16.mxu1 %v1440_v47 }
 0x19e   :  { %2013 = vmatmul.mubr.bf16.vlgmr.msra.gmra.mxu1 %v1438_v48 }
 0x19f   :  { %4641 = vmatpush3.bf16.msra.mxu1 %v4810_v50 }
 0x1a0   :  { %v4724_v55 = vpop.permute.xlu1 %4723  ;;  %4642 = vmatprep.subr.bf16.mxu1 %v4880_v0 }
 0x1a1   :  { %v4726_v60 = vunpack.i.h.bf16 %v4724_v55  ;;  %v4725_v59 = vunpack.i.l.bf16 %v4724_v55 }
 0x1a3   :  { %v785_v6 = vsel %vm427_vm4, %v665_v1, %v4726_v60  ;;  %v784_v7 = vsel %vm427_vm4, %v664_v63, %v4725_v59  ;;  %4643 = vmatpush3.bf16.msra.mxu1 %v4811_v56 }
 0x1a4   :  { %v4340_v8 = vpack.c.bf16 %v785_v6, %v775_v5  ;;  %v4339_v9 = vpack.c.bf16 %v784_v7, %v774_v4  ;;  %4644 = vmatprep.subr.bf16.mxu1 %v4880_v0  ;;  %v4729_v26 = vpop.permute.xlu1 %4728  ;;  %v667_v4 = vld [vmem:[#allocation3 + $0x32] sm:$0xff]  ;;  %v803_v5 = vpack.c.bf16 %v688_v58, %v687_v62 }
 0x1a5   :  { %v4731_v31 = vunpack.i.h.bf16 %v4729_v26  ;;  %v4730_v32 = vunpack.i.l.bf16 %v4729_v26  ;;  %v668_v26 = vld [vmem:[#allocation3 + $0x3a] sm:$0xff] }
 0x1a6   :  { %v957_v14 = vrot.slane %v4340_v8, %v5251_v11  ;;  %v950_v15 = vrot.slane %v4339_v9, %v5251_v11 }
 0x1a7   :  { %4645 = vmatpush3.bf16.msra.mxu1 %v4812_v10  ;;  %v786_v42 = vsel %vm427_vm4, %v666_v37, %v4731_v31  ;;  %v776_v43 = vsel %vm427_vm4, %v646_v36, %v4730_v32  ;;  %v1064_v10 = vrot.slane %v803_v5, %v5251_v11 }
 0x1a8   :  { %v974_v16 = vcombine.low %v957_v14, %v971_v13  ;;  %v975_v17 = vcombine.high %v957_v14, %v971_v13  ;;  %v972_v18 = vcombine.low %v950_v15, %v964_v12  ;;  %v973_v20 = vcombine.high %v950_v15, %v964_v12  ;;  %4646 = vmatprep.subr.bf16.mxu1 %v4880_v0 }
 0x1a9   :  { %v4342_v52 = vpack.c.bf16 %v786_v42, %v776_v43 }
 0x1aa   :  { %v989_v22 = vrot.slane %v974_v16, %v5251_v11  ;;  %v1003_v23 = vrot.slane %v975_v17, %v5251_v11  ;;  %v982_v24 = vrot.slane %v972_v18, %v5251_v11  ;;  %v996_v25 = vrot.slane %v973_v20, %v5251_v11 }
 0x1ab   :  { %4647 = vmatpush3.bf16.msra.mxu1 %v4813_v21  ;;  %v1015_v60 = vrot.slane %v4342_v52, %v5251_v11 }
 0x1ac   :  { %v1441_v27 = vcombine.low %v982_v24, %v996_v25  ;;  %v4372_v28 = vcombine.high %v982_v24, %v996_v25  ;;  %v1443_v29 = vcombine.low %v989_v22, %v1003_v23  ;;  %v4373_v30 = vcombine.high %v989_v22, %v1003_v23  ;;  %v648_v25 = vld [vmem:[#allocation3 + $0x38] sm:$0xff] }
 0x1ad   :  { %v1024_v8 = vcombine.high %v1015_v60, %v1022_v2  ;;  %v1023_v13 = vcombine.low %v1015_v60, %v1022_v2 }
 0x1ae   :  { %v1451_v33 = vrot.slane %v1441_v27, %v5251_v11  ;;  %v1458_v34 = vrot.slane %v4372_v28, %v5251_v11  ;;  %v1465_v19 = vrot.slane %v1443_v29, %v5251_v11  ;;  %v1472_v35 = vrot.slane %v4373_v30, %v5251_v11 }
 0x1af   :  { %v1038_v14 = vrot.slane %v1024_v8, %v5251_v11  ;;  %v1031_v18 = vrot.slane %v1023_v13, %v5251_v11  ;;  %v4345_v27 = vpack.c.bf16 %v688_v58, %v688_v58 }
 0x1b0   :  { %v1474_v38 = vcombine.high %v1451_v33, %v1458_v34  ;;  %v1476_v39 = vcombine.high %v1465_v19, %v1472_v35  ;;  %v1473_v40 = vcombine.low %v1451_v33, %v1458_v34  ;;  %v1475_v41 = vcombine.low %v1465_v19, %v1472_v35 }
 0x1b1   :  { %v1040_v20 = vcombine.high %v1038_v14, %v1038_v14  ;;  %v1039_v31 = vcombine.high %v1031_v18, %v1031_v18  ;;  %v1071_v35 = vrot.slane %v4345_v27, %v5251_v11 }
 0x1b2   :  { %v1490_v46 = vrot.slane %v1474_v38, %v5251_v11  ;;  %v1504_v47 = vrot.slane %v1476_v39, %v5251_v11  ;;  %v5317_v48 = vrot.slane %v1473_v40, %v5251_v11  ;;  %v5320_v50 = vrot.slane %v1475_v41, %v5251_v11 }
 0x1b3   :  { %v1508_v39 = vcombine.low %v1031_v18, %v1038_v14 }
 0x1b4   :  { %v1507_v53 = vcombine.low %v1490_v46, %v1504_v47  ;;  %v1505_v55 = vcombine.low %v5317_v48, %v5320_v50  ;;  %v1506_v56 = vcombine.high %v5317_v48, %v5320_v50  ;;  %v5341_v47 = vld [vmem:[#allocation3 + $0x4c] sm:$0xff] }
 0x1b5   :  { %v1518_v62 = vrot.slane %v1508_v39, %v5251_v11 }
 0x1b6   :  { %2020 = vmatprep.mubr.bf16.mxu1 %v1507_v53 }
 0x1b7   :  { %2021 = vmatmul.mubr.bf16.gmra.mxu1 %v1505_v55  ;;  %v4734_v59 = vpop.permute.xlu0 %4733  ;;  %v689_v55 = vld [vmem:[#allocation3 + $0x44] sm:$0xff] }
 0x1b8   :  { %v4736_v63 = vunpack.i.h.bf16 %v4734_v59  ;;  %v4735_v1 = vunpack.i.l.bf16 %v4734_v59 }
 0x1ba   :  { %v787_v6 = vsel %vm427_vm4, %v667_v4, %v4736_v63  ;;  %v777_v7 = vsel %vm427_vm4, %v647_v3, %v4735_v1  ;;  %v806_v63 = vpack.c.bf16 %v5341_v47, %v689_v55  ;;  %v649_v3 = vld [vmem:[#allocation3 + $0x40] sm:$0xff] }
 0x1bb   :  { %v4343_v9 = vpack.c.bf16 %v787_v6, %v777_v7  ;;  %v669_v4 = vld [vmem:[#allocation3 + $0x42] sm:$0xff] }
 0x1bd   :  { %v1050_v12 = vrot.slane %v4343_v9, %v5251_v11 }
 0x1bf   :  { %v1072_v15 = vcombine.low %v1050_v12, %v1064_v10  ;;  %v1073_v16 = vcombine.high %v1050_v12, %v1064_v10 }
 0x1c1   :  { %v1082_v17 = vrot.slane %v1072_v15, %v5251_v11  ;;  %v1096_v21 = vrot.slane %v1073_v16, %v5251_v11  ;;  %v1131_v15 = vrot.slane %v806_v63, %v5251_v11 }
 0x1c3   :  { %v4739_v22 = vpop.permute.xlu0 %4738  ;;  %v4350_v28 = vpack.i.b16 %v1082_v17, %v1040_v20  ;;  %v1104_v33 = vcombine.high %v1082_v17, %v1082_v17  ;;  %v1248_v34 = vunpack.i.h.s16 %v1082_v17  ;;  %v1250_v19 = vunpack.i.h.s16 %v1096_v21 }
 0x1c4   :  { %v4741_v23 = vunpack.i.h.bf16 %v4739_v22  ;;  %v4740_v24 = vunpack.i.l.bf16 %v4739_v22  ;;  %v1106_v37 = vcombine.high %v1096_v21, %v1096_v21 }
 0x1c5   :  { %v1509_v38 = vcombine.low %v1039_v31, %v4350_v28  ;;  %v1252_v41 = vunpack.i.h.s16 %v1104_v33  ;;  %v4351_v42 = vpack.i.b16 %v1096_v21, %v1248_v34  ;;  %v4352_v43 = vpack.i.b16 %v1104_v33, %v1250_v19  ;;  %v691_v19 = vld [vmem:[#allocation3 + $0x54] sm:$0x7f] }
 0x1c6   :  { %v788_v29 = vsel %vm427_vm4, %v668_v26, %v4741_v23  ;;  %v778_v30 = vsel %vm427_vm4, %v648_v25, %v4740_v24  ;;  %v1254_v51 = vunpack.i.h.s16 %v1106_v37 }
 0x1c7   :  { %v4344_v32 = vpack.c.bf16 %v788_v29, %v778_v30  ;;  %v1525_v52 = vrot.slane %v1509_v38, %v5251_v11  ;;  %v4353_v58 = vpack.i.b16 %v1106_v37, %v1252_v41  ;;  %v1510_v59 = vcombine.low %v4351_v42, %v4352_v43 }
 0x1c9   :  { %v1057_v36 = vrot.slane %v4344_v32, %v5251_v11  ;;  %v1541_v6 = vcombine.high %v1518_v62, %v1525_v52  ;;  %v1540_v10 = vcombine.low %v1518_v62, %v1525_v52  ;;  %v1532_v13 = vrot.slane %v1510_v59, %v5251_v11  ;;  %v650_v52 = vld [vmem:[#allocation3 + $0x48] sm:$0xff] }
 0x1ca   :  { %v670_v59 = vld [vmem:[#allocation3 + $0x4a] sm:$0xff] }
 0x1cb   :  { %v1074_v40 = vcombine.low %v1057_v36, %v1071_v35  ;;  %v1075_v53 = vcombine.high %v1057_v36, %v1071_v35  ;;  %v1557_v20 = vrot.slane %v1541_v6, %v5251_v11  ;;  %v5355_v22 = vrot.slane %v1540_v10, %v5251_v11 }
 0x1cc   :  { %v4348_v35 = vpack.c.bf16 %v5341_v47, %v5341_v47 }
 0x1cd   :  { %v1089_v46 = vrot.slane %v1074_v40, %v5251_v11  ;;  %v1103_v7 = vrot.slane %v1075_v53, %v5251_v11 }
 0x1cf   :  { %v4744_v57 = vpop.permute.xlu1 %4743  ;;  %v4354_v60 = vpack.i.b16 %v1089_v46, %v1254_v51  ;;  %v1105_v16 = vcombine.high %v1089_v46, %v1089_v46  ;;  %v1107_v23 = vcombine.high %v1103_v7, %v1103_v7  ;;  %v1256_v24 = vunpack.i.h.s16 %v1089_v46 }
 0x1d0   :  { %v4746_v1 = vunpack.i.h.bf16 %v4744_v57  ;;  %v4745_v2 = vunpack.i.l.bf16 %v4744_v57  ;;  %v1258_v25 = vunpack.i.h.s16 %v1103_v7  ;;  %v651_v57 = vld [vmem:[#allocation3 + $0x50] sm:$0x7f] }
 0x1d1   :  { %v1511_v5 = vcombine.low %v4353_v58, %v4354_v60  ;;  %v1260_v30 = vunpack.i.h.s16 %v1105_v16  ;;  %v1262_v36 = vunpack.i.h.s16 %v1107_v23  ;;  %v4355_v37 = vpack.i.b16 %v1103_v7, %v1256_v24  ;;  %v671_v58 = vld [vmem:[#allocation3 + $0x52] sm:$0x7f] }
 0x1d2   :  { %v789_v8 = vsel %vm427_vm4, %v669_v4, %v4746_v1  ;;  %v779_v9 = vsel %vm427_vm4, %v649_v3, %v4745_v2  ;;  %v4356_v43 = vpack.i.b16 %v1105_v16, %v1258_v25  ;;  %v809_v60 = vpack.c.bf16 %v691_v19, %v691_v19 }
 0x1d3   :  { %v4346_v12 = vpack.c.bf16 %v789_v8, %v779_v9  ;;  %v1539_v14 = vrot.slane %v1511_v5, %v5251_v11  ;;  %v4357_v47 = vpack.i.b16 %v1107_v23, %v1260_v30 }
 0x1d4   :  { %v1575_v9 = vcombine.low %v4355_v37, %v4356_v43 }
 0x1d5   :  { %v1117_v17 = vrot.slane %v4346_v12, %v5251_v11  ;;  %v1543_v18 = vcombine.high %v1532_v13, %v1539_v14  ;;  %v1542_v21 = vcombine.low %v1532_v13, %v1539_v14  ;;  %v1189_v12 = vrot.slane %v809_v60, %v5251_v11 }
 0x1d6   :  { %v1138_v14 = vrot.slane %v4348_v35, %v5251_v11 }
 0x1d7   :  { %v1139_v26 = vcombine.low %v1117_v17, %v1131_v15  ;;  %v1140_v27 = vcombine.high %v1117_v17, %v1131_v15  ;;  %v1571_v28 = vrot.slane %v1543_v18, %v5251_v11  ;;  %v5359_v29 = vrot.slane %v1542_v21, %v5251_v11 }
 0x1d9   :  { %v1149_v31 = vrot.slane %v1139_v26, %v5251_v11  ;;  %v1163_v32 = vrot.slane %v1140_v27, %v5251_v11  ;;  %v1574_v33 = vcombine.low %v1557_v20, %v1571_v28  ;;  %v1572_v34 = vcombine.low %v5355_v22, %v5359_v29 }
 0x1da   :  { %v1585_v26 = vrot.slane %v1575_v9, %v5251_v11 }
 0x1db   :  { %2028 = vmatprep.mubr.bf16.mxu1 %v1574_v33  ;;  %v1171_v40 = vcombine.high %v1149_v31, %v1149_v31  ;;  %v1264_v41 = vunpack.i.h.s16 %v1149_v31  ;;  %v1266_v42 = vunpack.i.h.s16 %v1163_v32  ;;  %v4358_v62 = vpack.i.b16 %v1149_v31, %v1262_v36 }
 0x1dc   :  { %v4754_v38 = vpop.permute.xlu1 %4753  ;;  %v4749_v39 = vpop.permute.xlu0 %4748  ;;  %2029 = vmatmul.mubr.bf16.gmra.mxu1 %v1572_v34  ;;  %v1173_v8 = vcombine.high %v1163_v32, %v1163_v32 }
 0x1dd   :  { %v4756_v46 = vunpack.i.h.bf16 %v4754_v38  ;;  %v4755_v51 = vunpack.i.l.bf16 %v4754_v38  ;;  %v4751_v53 = vunpack.i.h.bf16 %v4749_v39  ;;  %v4750_v55 = vunpack.i.l.bf16 %v4749_v39 }
 0x1de   :  { %v4359_v63 = vpack.i.b16 %v1163_v32, %v1264_v41  ;;  %v4360_v7 = vpack.i.b16 %v1171_v40, %v1266_v42  ;;  %v1576_v10 = vcombine.low %v4357_v47, %v4358_v62  ;;  %v1268_v16 = vunpack.i.h.s16 %v1171_v40 }
 0x1df   :  { %v791_v1 = vsel %vm427_vm4, %v671_v58, %v4756_v46  ;;  %v781_v2 = vsel %vm427_vm4, %v651_v57, %v4755_v51  ;;  %v790_v3 = vsel %vm427_vm4, %v670_v59, %v4751_v53  ;;  %v780_v4 = vsel %vm427_vm4, %v650_v52, %v4750_v55 }
 0x1e0   :  { %v4349_v5 = vpack.c.bf16 %v791_v1, %v781_v2  ;;  %v4347_v6 = vpack.c.bf16 %v790_v3, %v780_v4  ;;  %v1577_v17 = vcombine.low %v4359_v63, %v4360_v7  ;;  %v1592_v18 = vrot.slane %v1576_v10, %v5251_v11 }
 0x1e1   :  { %v1270_v25 = vunpack.i.h.s16 %v1173_v8  ;;  %v4361_v32 = vpack.i.b16 %v1173_v8, %v1268_v16 }
 0x1e2   :  { %v1182_v13 = vrot.slane %v4349_v5, %v5251_v11  ;;  %v1124_v15 = vrot.slane %v4347_v6, %v5251_v11  ;;  %v1599_v33 = vrot.slane %v1577_v17, %v5251_v11  ;;  %v1608_v34 = vcombine.high %v1585_v26, %v1592_v18 }
 0x1e3   :  { %v1607_v19 = vcombine.low %v1585_v26, %v1592_v18 }
 0x1e4   :  { %v1190_v20 = vcombine.low %v1182_v13, %v1189_v12  ;;  %v1191_v21 = vcombine.high %v1182_v13, %v1189_v12  ;;  %v1141_v23 = vcombine.low %v1124_v15, %v1138_v14  ;;  %v1142_v24 = vcombine.high %v1124_v15, %v1138_v14 }
 0x1e5   :  { %v1624_v6 = vrot.slane %v1608_v34, %v5251_v11  ;;  %v1617_v7 = vrot.slane %v1607_v19, %v5251_v11 }
 0x1e6   :  { %v1198_v27 = vrot.slane %v1190_v20, %v5251_v11  ;;  %v1205_v28 = vrot.slane %v1191_v21, %v5251_v11  ;;  %v1156_v30 = vrot.slane %v1141_v23, %v5251_v11  ;;  %v1170_v31 = vrot.slane %v1142_v24, %v5251_v11 }
 0x1e8   :  { %v4362_v35 = vpack.i.b16 %v1156_v30, %v1270_v25  ;;  %v1172_v36 = vcombine.high %v1156_v30, %v1156_v30  ;;  %v1174_v37 = vcombine.high %v1170_v31, %v1170_v31  ;;  %v1206_v38 = vcombine.high %v1198_v27, %v1198_v27 }
 0x1e9   :  { %v1207_v39 = vcombine.high %v1205_v28, %v1205_v28  ;;  %v1272_v40 = vunpack.i.h.s16 %v1156_v30  ;;  %v1274_v41 = vunpack.i.h.s16 %v1170_v31  ;;  %v1280_v42 = vunpack.i.h.s16 %v1198_v27 }
 0x1ea   :  { %v1578_v43 = vcombine.low %v4361_v32, %v4362_v35  ;;  %v1276_v46 = vunpack.i.h.s16 %v1172_v36  ;;  %v1278_v51 = vunpack.i.h.s16 %v1174_v37  ;;  %v1282_v52 = vunpack.i.h.s16 %v1205_v28 }
 0x1eb   :  { %v1284_v53 = vunpack.i.h.s16 %v1206_v38  ;;  %v4363_v55 = vpack.i.b16 %v1170_v31, %v1272_v40  ;;  %v4364_v57 = vpack.i.b16 %v1172_v36, %v1274_v41  ;;  %v4367_v58 = vpack.i.b16 %v1205_v28, %v1280_v42  ;;  %v4335_v31 = vld [vmem:[%s5840_s6] ss:$0 sm:$0xff] }
 0x1ec   :  { %v1606_v60 = vrot.slane %v1578_v43, %v5251_v11  ;;  %v4365_v59 = vpack.i.b16 %v1174_v37, %v1276_v46  ;;  %v4366_v47 = vpack.i.b16 %v1198_v27, %v1278_v51  ;;  %v4368_v62 = vpack.i.b16 %v1206_v38, %v1282_v52 }
 0x1ed   :  { %v4369_v63 = vpack.i.b16 %v1207_v39, %v1284_v53  ;;  %v1642_v1 = vcombine.low %v4363_v55, %v4364_v57  ;;  %v1573_v30 = vcombine.high %v5355_v22, %v5359_v29  ;;  %v1286_v32 = vcombine.high %v4335_v31, %v4335_v31 }
 0x1ee   :  { %v1610_v2 = vcombine.high %v1599_v33, %v1606_v60  ;;  %v1609_v3 = vcombine.low %v1599_v33, %v1606_v60  ;;  %v1643_v4 = vcombine.low %v4365_v59, %v4366_v47  ;;  %v1644_v5 = vcombine.low %v4367_v58, %v4368_v62 }
 0x1ef   :  { %v1651_v8 = vrot.slane %v1642_v1, %v5251_v11  ;;  %v1672_v9 = vrot.slane %v4369_v63, %v5251_v11  ;;  %v1293_v34 = vrot.slane %v4335_v31, %v5251_v11  ;;  %v1300_v19 = vrot.slane %v1286_v32, %v5251_v11 }
 0x1f0   :  { %v1638_v10 = vrot.slane %v1610_v2, %v5251_v11  ;;  %v1631_v12 = vrot.slane %v1609_v3, %v5251_v11  ;;  %v1658_v13 = vrot.slane %v1643_v4, %v5251_v11  ;;  %v1665_v14 = vrot.slane %v1644_v5, %v5251_v11 }
 0x1f1   :  { %v1301_v37 = vcombine.high %v1293_v34, %v1293_v34  ;;  %v1302_v38 = vcombine.high %v1300_v19, %v1300_v19  ;;  %v1309_v40 = vrot.slane %v1293_v34, %v5251_v11  ;;  %v1316_v42 = vrot.slane %v1300_v19, %v5251_v11 }
 0x1f2   :  { %v1641_v15 = vcombine.low %v1624_v6, %v1638_v10  ;;  %v1639_v16 = vcombine.low %v1617_v7, %v1631_v12  ;;  %v1674_v17 = vcombine.high %v1651_v8, %v1658_v13  ;;  %v1676_v18 = vcombine.high %v1665_v14, %v1672_v9 }
 0x1f3   :  { %v1673_v20 = vcombine.low %v1651_v8, %v1658_v13  ;;  %v1675_v24 = vcombine.low %v1665_v14, %v1672_v9  ;;  %v1640_v44 = vcombine.high %v1617_v7, %v1631_v12  ;;  %v1323_v41 = vrot.slane %v1301_v37, %v5251_v11 }
 0x1f4   :  { %2036 = vmatprep.mubr.bf16.mxu1 %v1641_v15  ;;  %v1690_v21 = vrot.slane %v1674_v17, %v5251_v11  ;;  %v1704_v23 = vrot.slane %v1676_v18, %v5251_v11  ;;  %v1330_v43 = vrot.slane %v1302_v38, %v5251_v11  ;;  %v1332_v57 = vcombine.high %v1316_v42, %v1316_v42 }
 0x1f5   :  { %2037 = vmatmul.mubr.bf16.gmra.mxu1 %v1639_v16  ;;  %v1683_v26 = vrot.slane %v1673_v20, %v5251_v11  ;;  %v1697_v27 = vrot.slane %v1675_v24, %v5251_v11  ;;  %v1838_v51 = vcombine.low %v1309_v40, %v1323_v41  ;;  %v4394_v52 = vcombine.high %v1309_v40, %v1323_v41 }
 0x1f6   :  { %v1707_v25 = vcombine.low %v1690_v21, %v1704_v23  ;;  %v1840_v53 = vcombine.low %v1316_v42, %v1330_v43  ;;  %v4395_v55 = vcombine.high %v1316_v42, %v1330_v43  ;;  %v1331_v59 = vcombine.high %v1309_v40, %v1309_v40 }
 0x1f7   :  { %v1705_v28 = vcombine.low %v1683_v26, %v1697_v27  ;;  %v1706_v45 = vcombine.high %v1683_v26, %v1697_v27  ;;  %v1848_v60 = vrot.slane %v1838_v51, %v5251_v11  ;;  %v1333_v47 = vcombine.high %v1323_v41, %v1323_v41 }
 0x1f8   :  { %2044 = vmatprep.mubr.bf16.mxu1 %v1707_v25  ;;  %v1334_v62 = vcombine.high %v1330_v43, %v1330_v43  ;;  %v1855_v63 = vrot.slane %v4394_v52, %v5251_v11  ;;  %v1862_v1 = vrot.slane %v1840_v53, %v5251_v11  ;;  %v1869_v2 = vrot.slane %v4395_v55, %v5251_v11 }
 0x1f9   :  { %v1887_v3 = vcombine.low %v1332_v57, %v1309_v40  ;;  %v1904_v6 = vcombine.low %v1323_v41, %v1331_v59  ;;  %v1905_v7 = vcombine.low %v1333_v47, %v1316_v42  ;;  %v1906_v8 = vcombine.low %v1330_v43, %v1332_v57 }
 0x1fa   :  { %v1907_v9 = vcombine.low %v1334_v62, %v1309_v40  ;;  %v1870_v10 = vcombine.low %v1848_v60, %v1855_v63  ;;  %v1871_v12 = vcombine.low %v1862_v1, %v1869_v2 }
 0x1fb   :  { %v1894_v13 = vrot.slane %v1887_v3, %v5251_v11  ;;  %v1914_v16 = vrot.slane %v1904_v6, %v5251_v11  ;;  %v1921_v17 = vrot.slane %v1905_v7, %v5251_v11  ;;  %v1928_v18 = vrot.slane %v1906_v8, %v5251_v11 }
 0x1fc   :  { %v1935_v20 = vrot.slane %v1907_v9, %v5251_v11  ;;  %v1878_v23 = vrot.slane %v1870_v10, %v5251_v11  ;;  %v1885_v24 = vrot.slane %v1871_v12, %v5251_v11 }
 0x1fd   :  { %2045 = vmatmul.mubr.bf16.gmra.mxu1 %v1705_v28  ;;  %v1895_v25 = vcombine.low %v1862_v1, %v1894_v13  ;;  %v1936_v28 = vcombine.low %v1914_v16, %v1921_v17  ;;  %v1959_v53 = vrot.slane %v1928_v18, %v5251_v11 }
 0x1fe   :  { %4648 = vmatprep.mubr.msk.bf16.mxu1 %vm4881_vm1, %v4880_v0  ;;  %v1886_v31 = vcombine.low %v1878_v23, %v1885_v24 }
 0x1ff   :  { %v1902_v32 = vrot.slane %v1895_v25, %v5251_v11  ;;  %v1944_v37 = vrot.slane %v1936_v28, %v5251_v11 }
 0x201   :  { %v1903_v43 = vcombine.low %v1878_v23, %v1902_v32 }
 0x205   :  { %4649 = vmatmul.mubr.msk.bf16.vlgmr.msra.gmra.mxu1 %vm427_vm4, %v1439_v49 }
 0x206   :  { %4652 = vmatprep.mubr.msk.bf16.mxu1 %vm4881_vm1, %v4880_v0 }
 0x20d   :  { %4653 = vmatmul.mubr.msk.bf16.gmra.mxu1 %vm427_vm4, %v1506_v56 }
 0x20e   :  { %4656 = vmatprep.mubr.msk.bf16.mxu1 %vm4881_vm1, %v4880_v0 }
 0x215   :  { %4657 = vmatmul.mubr.msk.bf16.gmra.mxu1 %vm427_vm4, %v1573_v30  ;;  %v1937_v30 = vcombine.low %v1928_v18, %v1935_v20 }
 0x216   :  { %4660 = vmatprep.mubr.msk.bf16.mxu1 %vm4881_vm1, %v4880_v0 }
 0x217   :  { %v1951_v38 = vrot.slane %v1937_v30, %v5251_v11 }
 0x219   :  { %v1952_v47 = vcombine.low %v1944_v37, %v1951_v38  ;;  %v4815_v38 = vld [vmem:[%s5843_s9 + $0x90] sm:$0xff]  }
 0x21d   :  { %4661 = vmatmul.mubr.msk.bf16.gmra.mxu1 %vm427_vm4, %v1640_v44 }
 0x21e   :  { %4664 = vmatprep.mubr.msk.bf16.mxu1 %vm4881_vm1, %v4880_v0 }
 0x225   :  { %4665 = vmatmul.mubr.msk.bf16.gmra.mxu1 %vm427_vm4, %v1706_v45 }
 0x25e   :  { %v4494_v49 = vpop.f32.mrf.mxu1 }
 0x260   :  { %v4495_v48 = vpop.f32.mrf.mxu1 }
 0x261   :  { %v4496_v44 = vadd.f32 %v4495_v48, %v4494_v49 }
 0x262   :  { %v5418_v50 = vpop.f32.mrf.mxu1 }
 0x263   :  { %v2015_v42 = vadd.f32 %v4496_v44, %v1886_v31 }
 0x264   :  { %v5420_v56 = vpop.f32.mrf.mxu1 }
 0x265   :  { %v4499_v40 = vadd.f32 %v5420_v56, %v5418_v50 }
 0x267   :  { %v2018_v56 = vadd.f32 %v4499_v40, %v1886_v31 }
 0x277   :  { %v5422_v22 = vpop.f32.mrf.mxu1 }
 0x279   :  { %v5424_v29 = vpop.f32.mrf.mxu1 }
 0x27a   :  { %v4502_v51 = vadd.f32 %v5424_v29, %v5422_v22  ;;  %v1960_v29 = vcombine.low %v1944_v37, %v1959_v53  ;;  %v4814_v37 = vld [vmem:[%s5843_s9 + $0x98] sm:$0xff]  }
 0x27b   :  { %v5429_v33 = vpop.f32.mrf.mxu1  ;;  %4668 = vmatprep.subr.bf16.mxu0 %v4814_v37 }
 0x27c   :  { %v5458_v1 = vadd.f32 %v4502_v51, %v1886_v31  ;;  %v4817_v51 = vld [vmem:[%s5843_s9 + $0x78] sm:$0xff]   ;;  %4669 = vmatpush3.bf16.msra.mxu0 %v4814_v37 }
 0x27d   :  { %v4504_v35 = vpop.f32.mrf.mxu1  ;;  %4670 = vmatprep.subr.bf16.mxu0 %v4815_v38  ;;  %4533 = vmatprep.subr.bf16.mxu1 %v4817_v51 }
 0x27e   :  { %v4505_v49 = vadd.f32 %v4504_v35, %v5429_v33 }
 0x280   :  { %v5460_v2 = vadd.f32 %v4505_v49, %v1886_v31  ;;  %v4818_v49 = vld [vmem:[%s5843_s9 + $0x38] sm:$0xff]   ;;  %4671 = vmatpush3.bf16.msra.mxu0 %v4815_v38  ;;  %v4823_v38 = vld [vmem:[%s5843_s9 + $0x60] sm:$0xff]  }
 0x281   :  { %4534 = vmatpush3.bf16.msra.mxu1 %v4818_v49 }
 0x29c   :  { %v4506_v36 = vpop.f32.mrf.mxu1 }
 0x29e   :  { %v4507_v39 = vpop.f32.mrf.mxu1 }
 0x29f   :  { %v4508_v48 = vadd.f32 %v4507_v39, %v4506_v36 }
 0x2a0   :  { %v4509_v46 = vpop.f32.mrf.mxu1 }
 0x2a1   :  { %v5462_v22 = vadd.f32 %v4508_v48, %v1903_v43 }
 0x2a2   :  { %v4510_v58 = vpop.f32.mrf.mxu1 }
 0x2a3   :  { %v4511_v57 = vadd.f32 %v4510_v58, %v4509_v46 }
 0x2a5   :  { %v5466_v58 = vadd.f32 %v4511_v57, %v1952_v47 }
 0x2b5   :  { %v4512_v4 = vpop.f32.mrf.mxu1 }
 0x2b7   :  { %v4513_v5 = vpop.f32.mrf.mxu1 }
 0x2b8   :  { %v4514_v60 = vadd.f32 %v4513_v5, %v4512_v4 }
 0x2b9   :  { %v4515_v14 = vpop.f32.mrf.mxu1 }
 0x2ba   :  { %v5468_v3 = vadd.f32 %v4514_v60, %v1952_v47  ;;  %v4819_v60 = vld [vmem:[%s5843_s9 + $0x70] sm:$0xff]  }
 0x2bb   :  { %v4516_v15 = vpop.f32.mrf.mxu1  ;;  %4535 = vmatprep.subr.bf16.mxu1 %v4819_v60 }
 0x2bc   :  { %v4517_v21 = vadd.f32 %v4516_v15, %v4515_v14 }
 0x2bd   :  { %v4518_v26 = vpop.f32.mrf.mxu1 }
 0x2be   :  { %v5470_v4 = vadd.f32 %v4517_v21, %v1952_v47 }
 0x2bf   :  { %v4519_v27 = vpop.f32.mrf.mxu1 }
 0x2c0   :  { %v4520_v45 = vadd.f32 %v4519_v27, %v4518_v26 }
 0x2c1   :  { %v4521_v34 = vpop.f32.mrf.mxu1 }
 0x2c2   :  { %v5472_v5 = vadd.f32 %v4520_v45, %v1952_v47 }
 0x2c3   :  { %v4522_v19 = vpop.f32.mrf.mxu1 }
 0x2c4   :  { %v4523_v41 = vadd.f32 %v4522_v19, %v4521_v34 }
 0x2c5   :  { %v2087_v52 = vpop.f32.mrf.mxu1 }
 0x2c6   :  { %v2088_v55 = vadd.f32 %v2087_v52, %v2015_v42  ;;  %v5479_v15 = vadd.f32 %v4523_v41, %v1960_v29 }
 0x2c7   :  { %v4650_v59 = vpop.f32.mrf.mxu1 }
 0x2c8   :  { %v2136_v62 = vcombine.high %v2088_v55, %v2088_v55  ;;  %v2143_v50 = vrot.slane %v2088_v55, %v5251_v11 }
 0x2c9   :  { %v2090_v63 = vpop.f32.mrf.mxu1 }
 0x2ca   :  { %v2150_v33 = vrot.slane %v2136_v62, %v5251_v11  ;;  %v2151_v35 = vcombine.high %v2143_v50, %v2143_v50  ;;  %v2159_v36 = vrot.slane %v2143_v50, %v5251_v11  ;;  %v2091_v39 = vadd.f32 %v2090_v63, %v2018_v56 }
 0x2cb   :  { %v4651_v46 = vpop.f32.mrf.mxu1 }
 0x2cc   :  { %v2152_v6 = vcombine.high %v2150_v33, %v2150_v33  ;;  %v2166_v7 = vrot.slane %v2150_v33, %v5251_v11  ;;  %v2173_v8 = vrot.slane %v2151_v35, %v5251_v11  ;;  %v2181_v9 = vcombine.high %v2159_v36, %v2159_v36 }
 0x2cd   :  { %v2702_v10 = vmax.f32 %v2159_v36, 0.0  ;;  %v2185_v12 = vcombine.high %v2091_v39, %v2091_v39  ;;  %v2192_v13 = vrot.slane %v2091_v39, %v5251_v11  ;;  %v5477_v14 = vpop.f32.mrf.mxu1  ;;  %v4816_v36 = vld [vmem:[%s5843_s9 + $0x88] sm:$0xff]  }
 0x2ce   :  { %v2180_v16 = vrot.slane %v2152_v6, %v5251_v11  ;;  %v2182_v17 = vcombine.high %v2166_v7, %v2166_v7  ;;  %v2183_v18 = vcombine.high %v2173_v8, %v2173_v8  ;;  %v2703_v20 = vmax.f32 %v2173_v8, 0.0  ;;  %v4820_v8 = vld [vmem:[%s5843_s9 + $0x30] sm:$0xff]   ;;  %4672 = vmatprep.subr.bf16.mxu0 %v4816_v36 }
 0x2cf   :  { %v2704_v21 = vmax.f32 %v2181_v9, 0.0  ;;  %v2706_v23 = vmax.f32 %v2166_v7, 0.0  ;;  %v2199_v24 = vrot.slane %v2185_v12, %v5251_v11  ;;  %v2200_v25 = vcombine.high %v2192_v13, %v2192_v13  ;;  %v4654_v26 = vpop.f32.mrf.mxu1  ;;  %4536 = vmatpush3.bf16.msra.mxu1 %v4820_v8  ;;  %4673 = vmatpush3.bf16.msra.mxu0 %v4816_v36 }
 0x2d0   :  { %v2184_v27 = vcombine.high %v2180_v16, %v2180_v16  ;;  %v2705_v28 = vmax.f32 %v2183_v18, 0.0  ;;  %v2707_v30 = vmax.f32 %v2180_v16, 0.0  ;;  %v2708_v44 = vmax.f32 %v2182_v17, 0.0  ;;  %v4821_v17 = vld [vmem:[%s5843_s9 + $0x68] sm:$0xff]  }
 0x2d1   :  { %v2858_v45 = vcombine.low %v2702_v10, %v2703_v20  ;;  %v2201_v31 = vcombine.high %v2199_v24, %v2199_v24  ;;  %v2208_v32 = vrot.slane %v2192_v13, %v5251_v11  ;;  %v2215_v34 = vrot.slane %v2199_v24, %v5251_v11  ;;  %v2098_v19 = vpop.f32.mrf.mxu1  ;;  %4537 = vmatprep.subr.bf16.mxu1 %v4821_v17 }
 0x2d2   :  { %v2709_v40 = vmax.f32 %v2184_v27, 0.0  ;;  %v2859_v41 = vcombine.low %v2704_v21, %v2705_v28  ;;  %v2860_v42 = vcombine.low %v2706_v23, %v2707_v30  ;;  %v2222_v43 = vrot.slane %v2200_v25, %v5251_v11  ;;  %v4825_v30 = vld [vmem:[%s5843_s9 + $0x80] sm:$0xff]  }
 0x2d3   :  { %v2868_v48 = vrot.slane %v2858_v45, %v5251_v11  ;;  %v2229_v52 = vrot.slane %v2201_v31, %v5251_v11  ;;  %v2230_v53 = vcombine.high %v2208_v32, %v2208_v32  ;;  %v2231_v55 = vcombine.high %v2215_v34, %v2215_v34  ;;  %v4655_v57 = vpop.f32.mrf.mxu1  ;;  %4674 = vmatprep.subr.bf16.mxu0 %v4825_v30 }
 0x2d4   :  { %v2861_v59 = vcombine.low %v2708_v44, %v2709_v40  ;;  %v2875_v47 = vrot.slane %v2859_v41, %v5251_v11  ;;  %v2882_v62 = vrot.slane %v2860_v42, %v5251_v11  ;;  %v2232_v50 = vcombine.high %v2222_v43, %v2222_v43  ;;  %4675 = vmatpush3.bf16.msra.mxu0 %v4825_v30 }
 0x2d5   :  { %v2233_v56 = vcombine.high %v2229_v52, %v2229_v52  ;;  %v2710_v63 = vmax.f32 %v2208_v32, 0.0  ;;  %v2711_v29 = vmax.f32 %v2222_v43, 0.0  ;;  %v2712_v33 = vmax.f32 %v2230_v53, 0.0  ;;  %v5505_v35 = vpop.f32.mrf.mxu1  ;;  %4680 = vmatprep.subr.bf16.mxu0 %v4880_v0 }
 0x2d6   :  { %v2889_v39 = vrot.slane %v2861_v59, %v5251_v11  ;;  %v2890_v46 = vcombine.low %v2868_v48, %v2875_v47  ;;  %v2713_v6 = vmax.f32 %v2232_v50, 0.0  ;;  %v2714_v7 = vmax.f32 %v2215_v34, 0.0  ;;  %v4824_v47 = vld [vmem:[%s5843_s9 + $0x20] sm:$0xff]  }
 0x2d7   :  { %v2715_v9 = vmax.f32 %v2229_v52, 0.0  ;;  %v2716_v10 = vmax.f32 %v2231_v55, 0.0  ;;  %v2717_v12 = vmax.f32 %v2233_v56, 0.0  ;;  %v2907_v13 = vcombine.low %v2710_v63, %v2711_v29  ;;  %v4658_v16 = vpop.f32.mrf.mxu1 }
 0x2d8   :  { %v2891_v18 = vcombine.low %v2882_v62, %v2889_v39  ;;  %v2898_v20 = vrot.slane %v2890_v46, %v5251_v11  ;;  %v2908_v21 = vcombine.low %v2712_v33, %v2713_v6  ;;  %v2096_v23 = vadd.f32 %v5477_v14, %v5458_v1  ;;  %v4822_v14 = vld [vmem:[%s5843_s9 + $0x28] sm:$0xff]  }
 0x2d9   :  { %v2909_v24 = vcombine.low %v2714_v7, %v2715_v9  ;;  %v2910_v25 = vcombine.low %v2716_v10, %v2717_v12  ;;  %v2917_v26 = vrot.slane %v2907_v13, %v5251_v11  ;;  %v2099_v27 = vadd.f32 %v2098_v19, %v5460_v2  ;;  %v5522_v28 = vpop.f32.mrf.mxu1  ;;  %4538 = vmatpush3.bf16.msra.mxu1 %v4822_v14 }
 0x2da   :  { %v2905_v44 = vrot.slane %v2891_v18, %v5251_v11  ;;  %v2924_v45 = vrot.slane %v2908_v21, %v5251_v11  ;;  %v2234_v31 = vcombine.high %v2096_v23, %v2096_v23  ;;  %v2241_v1 = vrot.slane %v2096_v23, %v5251_v11  ;;  %4539 = vmatprep.subr.bf16.mxu1 %v4823_v38 }
 0x2db   :  { %v2931_v2 = vrot.slane %v2909_v24, %v5251_v11  ;;  %v2938_v32 = vrot.slane %v2910_v25, %v5251_v11  ;;  %v2283_v34 = vcombine.high %v2099_v27, %v2099_v27  ;;  %v2290_v19 = vrot.slane %v2099_v27, %v5251_v11  ;;  %v4659_v37 = vpop.f32.mrf.mxu1 }
 0x2dc   :  { %v2906_v40 = vcombine.low %v2898_v20, %v2905_v44  ;;  %v2939_v41 = vcombine.low %v2917_v26, %v2924_v45  ;;  %v2248_v42 = vrot.slane %v2234_v31, %v5251_v11  ;;  %v2249_v43 = vcombine.high %v2241_v1, %v2241_v1 }
 0x2dd   :  { %v2940_v51 = vcombine.low %v2931_v2, %v2938_v32  ;;  %v2257_v49 = vrot.slane %v2241_v1, %v5251_v11  ;;  %v2297_v48 = vrot.slane %v2283_v34, %v5251_v11  ;;  %v2298_v52 = vcombine.high %v2290_v19, %v2290_v19  ;;  %v5542_v53 = vpop.f32.mrf.mxu1  ;;  %4540 = vmatpush3.bf16.msra.mxu1 %v4824_v47 }
 0x2de   :  { %3356 = vst.msk [vmem:[#allocation4] sm:$0xff] %vm427_vm4, %v2906_v40  ;;  %v2947_v55 = vrot.slane %v2939_v41, %v5251_v11  ;;  %v2250_v57 = vcombine.high %v2248_v42, %v2248_v42  ;;  %v2264_v60 = vrot.slane %v2248_v42, %v5251_v11  ;;  %v2271_v59 = vrot.slane %v2249_v43, %v5251_v11 }
 0x2df   :  { %v2954_v62 = vrot.slane %v2940_v51, %v5251_v11  ;;  %v2279_v50 = vcombine.high %v2257_v49, %v2257_v49  ;;  %v2718_v56 = vmax.f32 %v2257_v49, 0.0  ;;  %v2299_v63 = vcombine.high %v2297_v48, %v2297_v48  ;;  %v4662_v29 = vpop.f32.mrf.mxu1 }
 0x2e0   :  { %v2278_v33 = vrot.slane %v2250_v57, %v5251_v11  ;;  %v2280_v36 = vcombine.high %v2264_v60, %v2264_v60  ;;  %v2281_v39 = vcombine.high %v2271_v59, %v2271_v59  ;;  %v2719_v46 = vmax.f32 %v2271_v59, 0.0 }
 0x2e1   :  { %v2955_v6 = vcombine.low %v2947_v55, %v2954_v62  ;;  %v2720_v7 = vmax.f32 %v2279_v50, 0.0  ;;  %v2722_v8 = vmax.f32 %v2264_v60, 0.0  ;;  %v2306_v9 = vrot.slane %v2290_v19, %v5251_v11  ;;  %v5554_v10 = vpop.f32.mrf.mxu1 }
 0x2e2   :  { %v2282_v12 = vcombine.high %v2278_v33, %v2278_v33  ;;  %v2721_v13 = vmax.f32 %v2281_v39, 0.0  ;;  %v2723_v16 = vmax.f32 %v2278_v33, 0.0  ;;  %v2724_v17 = vmax.f32 %v2280_v36, 0.0 }
 0x2e3   :  { %3357 = vst.msk [vmem:[#allocation4 + $0x8] sm:$0xff] %vm427_vm4, %v2955_v6  ;;  %v2956_v18 = vcombine.low %v2718_v56, %v2719_v46  ;;  %v2313_v20 = vrot.slane %v2297_v48, %v5251_v11  ;;  %v2320_v21 = vrot.slane %v2298_v52, %v5251_v11  ;;  %v2327_v23 = vrot.slane %v2299_v63, %v5251_v11  ;;  %v4663_v24 = vpop.f32.mrf.mxu1 }
 0x2e4   :  { %v2725_v25 = vmax.f32 %v2282_v12, 0.0  ;;  %v2957_v26 = vcombine.low %v2720_v7, %v2721_v13  ;;  %v2958_v27 = vcombine.low %v2722_v8, %v2723_v16  ;;  %v2328_v30 = vcombine.high %v2306_v9, %v2306_v9 }
 0x2e5   :  { %v2966_v44 = vrot.slane %v2956_v18, %v5251_v11  ;;  %v2329_v45 = vcombine.high %v2313_v20, %v2313_v20  ;;  %v2330_v31 = vcombine.high %v2320_v21, %v2320_v21  ;;  %v2331_v1 = vcombine.high %v2327_v23, %v2327_v23  ;;  %v5562_v14 = vpop.f32.mrf.mxu1 }
 0x2e6   :  { %v2959_v2 = vcombine.low %v2724_v17, %v2725_v25  ;;  %v2973_v32 = vrot.slane %v2957_v26, %v5251_v11  ;;  %v2980_v34 = vrot.slane %v2958_v27, %v5251_v11  ;;  %v2726_v19 = vmax.f32 %v2306_v9, 0.0 }
 0x2e7   :  { %v2727_v37 = vmax.f32 %v2320_v21, 0.0  ;;  %v2728_v38 = vmax.f32 %v2328_v30, 0.0  ;;  %v2729_v40 = vmax.f32 %v2330_v31, 0.0  ;;  %v2730_v41 = vmax.f32 %v2313_v20, 0.0  ;;  %v4666_v42 = vpop.f32.mrf.mxu1 }
 0x2e8   :  { %v2987_v43 = vrot.slane %v2959_v2, %v5251_v11  ;;  %v2988_v51 = vcombine.low %v2966_v44, %v2973_v32  ;;  %v2731_v49 = vmax.f32 %v2327_v23, 0.0  ;;  %v2732_v48 = vmax.f32 %v2329_v45, 0.0 }
 0x2e9   :  { %v2733_v52 = vmax.f32 %v2331_v1, 0.0  ;;  %v3005_v55 = vcombine.low %v2726_v19, %v2727_v37  ;;  %v3006_v57 = vcombine.low %v2728_v38, %v2729_v40  ;;  %v2104_v60 = vadd.f32 %v5505_v35, %v5462_v22  ;;  %v5569_v59 = vpop.f32.mrf.mxu1 }
 0x2ea   :  { %v2989_v47 = vcombine.low %v2980_v34, %v2987_v43  ;;  %v2996_v62 = vrot.slane %v2988_v51, %v5251_v11  ;;  %v3007_v50 = vcombine.low %v2730_v41, %v2731_v49  ;;  %v2107_v56 = vadd.f32 %v5522_v28, %v5466_v58 }
 0x2eb   :  { %v3008_v63 = vcombine.low %v2732_v48, %v2733_v52  ;;  %v3015_v29 = vrot.slane %v3005_v55, %v5251_v11  ;;  %v3022_v33 = vrot.slane %v3006_v57, %v5251_v11  ;;  %v2332_v36 = vcombine.high %v2104_v60, %v2104_v60  ;;  %v4667_v39 = vpop.f32.mrf.mxu1 }
 0x2ec   :  { %v3003_v46 = vrot.slane %v2989_v47, %v5251_v11  ;;  %v3029_v22 = vrot.slane %v3007_v50, %v5251_v11  ;;  %v2339_v35 = vrot.slane %v2104_v60, %v5251_v11  ;;  %v2381_v6 = vcombine.high %v2107_v56, %v2107_v56 }
 0x2ed   :  { %v3036_v7 = vrot.slane %v3008_v63, %v5251_v11  ;;  %v3037_v8 = vcombine.low %v3015_v29, %v3022_v33  ;;  %v2346_v9 = vrot.slane %v2332_v36, %v5251_v11  ;;  %v2388_v58 = vrot.slane %v2107_v56, %v5251_v11 }
 0x2ee   :  { %v3004_v28 = vcombine.low %v2996_v62, %v3003_v46  ;;  %v2347_v12 = vcombine.high %v2339_v35, %v2339_v35  ;;  %v2355_v13 = vrot.slane %v2339_v35, %v5251_v11  ;;  %v2395_v16 = vrot.slane %v2381_v6, %v5251_v11 }
 0x2ef   :  { %v3038_v17 = vcombine.low %v3029_v22, %v3036_v7  ;;  %v3045_v18 = vrot.slane %v3037_v8, %v5251_v11  ;;  %v2348_v20 = vcombine.high %v2346_v9, %v2346_v9  ;;  %v2362_v21 = vrot.slane %v2346_v9, %v5251_v11 }
 0x2f0   :  { %3358 = vst.msk [vmem:[#allocation4 + $0x10] sm:$0xff] %vm427_vm4, %v3004_v28  ;;  %v2369_v23 = vrot.slane %v2347_v12, %v5251_v11  ;;  %v2377_v24 = vcombine.high %v2355_v13, %v2355_v13  ;;  %v2734_v25 = vmax.f32 %v2355_v13, 0.0  ;;  %v2396_v26 = vcombine.high %v2388_v58, %v2388_v58 }
 0x2f1   :  { %v3052_v27 = vrot.slane %v3038_v17, %v5251_v11  ;;  %v2376_v30 = vrot.slane %v2348_v20, %v5251_v11  ;;  %v2378_v44 = vcombine.high %v2362_v21, %v2362_v21  ;;  %v2738_v45 = vmax.f32 %v2362_v21, 0.0 }
 0x2f2   :  { %v2379_v31 = vcombine.high %v2369_v23, %v2369_v23  ;;  %v2735_v1 = vmax.f32 %v2369_v23, 0.0  ;;  %v2736_v2 = vmax.f32 %v2377_v24, 0.0  ;;  %v2397_v32 = vcombine.high %v2395_v16, %v2395_v16 }
 0x2f3   :  { %v3053_v34 = vcombine.low %v3045_v18, %v3052_v27  ;;  %v2380_v19 = vcombine.high %v2376_v30, %v2376_v30  ;;  %v2739_v37 = vmax.f32 %v2376_v30, 0.0  ;;  %v2740_v38 = vmax.f32 %v2378_v44, 0.0 }
 0x2f4   :  { %v2737_v40 = vmax.f32 %v2379_v31, 0.0  ;;  %v3054_v41 = vcombine.low %v2734_v25, %v2735_v1  ;;  %v2404_v42 = vrot.slane %v2388_v58, %v5251_v11  ;;  %v2411_v43 = vrot.slane %v2395_v16, %v5251_v11 }
 0x2f5   :  { %3359 = vst.msk [vmem:[#allocation4 + $0x18] sm:$0xff] %vm427_vm4, %v3053_v34  ;;  %v3056_v51 = vcombine.low %v2738_v45, %v2739_v37  ;;  %v3084_v49 = vrot.slane %v2740_v38, %v5251_v11  ;;  %v2418_v48 = vrot.slane %v2396_v26, %v5251_v11  ;;  %v2425_v52 = vrot.slane %v2397_v32, %v5251_v11 }
 0x2f6   :  { %v3055_v55 = vcombine.low %v2736_v2, %v2737_v40  ;;  %v3063_v57 = vrot.slane %v3054_v41, %v5251_v11  ;;  %v2426_v60 = vcombine.high %v2404_v42, %v2404_v42  ;;  %v2427_v47 = vcombine.high %v2411_v43, %v2411_v43 }
 0x2f7   :  { %v3077_v62 = vrot.slane %v3056_v51, %v5251_v11  ;;  %v2428_v50 = vcombine.high %v2418_v48, %v2418_v48  ;;  %v2429_v56 = vcombine.high %v2425_v52, %v2425_v52  ;;  %v2741_v63 = vmax.f32 %v2380_v19, 0.0 }
 0x2f8   :  { %v3070_v29 = vrot.slane %v3055_v55, %v5251_v11  ;;  %v2742_v33 = vmax.f32 %v2404_v42, 0.0  ;;  %v2743_v36 = vmax.f32 %v2418_v48, 0.0  ;;  %v2744_v39 = vmax.f32 %v2426_v60, 0.0 }
 0x2f9   :  { %v3086_v46 = vcombine.low %v3077_v62, %v3084_v49  ;;  %v2745_v22 = vmax.f32 %v2428_v50, 0.0  ;;  %v2746_v35 = vmax.f32 %v2411_v43, 0.0  ;;  %v2747_v6 = vmax.f32 %v2425_v52, 0.0 }
 0x2fa   :  { %v3085_v7 = vcombine.low %v3063_v57, %v3070_v29  ;;  %v2748_v8 = vmax.f32 %v2427_v47, 0.0  ;;  %v3102_v9 = vcombine.low %v2741_v63, %v2742_v33  ;;  %v3103_v58 = vcombine.low %v2743_v36, %v2744_v39 }
 0x2fb   :  { %v3100_v28 = vrot.slane %v3086_v46, %v5251_v11  ;;  %v3104_v12 = vcombine.low %v2745_v22, %v2746_v35  ;;  %v2112_v13 = vadd.f32 %v5542_v53, %v5468_v3  ;;  %v2749_v16 = vmax.f32 %v2429_v56, 0.0 }
 0x2fc   :  { %v3093_v17 = vrot.slane %v3085_v7, %v5251_v11  ;;  %v3105_v18 = vcombine.low %v2747_v6, %v2748_v8  ;;  %v3112_v20 = vrot.slane %v3102_v9, %v5251_v11  ;;  %v3119_v21 = vrot.slane %v3103_v58, %v5251_v11 }
 0x2fd   :  { %v3126_v23 = vrot.slane %v3104_v12, %v5251_v11  ;;  %v2430_v24 = vcombine.high %v2112_v13, %v2112_v13  ;;  %v2437_v25 = vrot.slane %v2112_v13, %v5251_v11  ;;  %v2115_v26 = vadd.f32 %v5554_v10, %v5470_v4 }
 0x2fe   :  { %v3101_v27 = vcombine.low %v3093_v17, %v3100_v28  ;;  %v3133_v30 = vrot.slane %v3105_v18, %v5251_v11  ;;  %v3134_v3 = vcombine.low %v3112_v20, %v3119_v21  ;;  %v5612_v53 = vadd.f32 %v5562_v14, %v5472_v5 }
 0x2ff   :  { %v2444_v44 = vrot.slane %v2430_v24, %v5251_v11  ;;  %v2445_v45 = vcombine.high %v2437_v25, %v2437_v25  ;;  %v2453_v31 = vrot.slane %v2437_v25, %v5251_v11  ;;  %v2479_v1 = vcombine.high %v2115_v26, %v2115_v26 }
 0x300   :  { %3360 = vst.msk [vmem:[#allocation4 + $0x20] sm:$0x7f] %vm635_vm5, %v3101_v27  ;;  %v3135_v2 = vcombine.low %v3126_v23, %v3133_v30  ;;  %v3142_v32 = vrot.slane %v3134_v3, %v5251_v11  ;;  %v2486_v4 = vrot.slane %v2115_v26, %v5251_v11  ;;  %v2528_v10 = vcombine.high %v5612_v53, %v5612_v53 }
 0x301   :  { %v2446_v34 = vcombine.high %v2444_v44, %v2444_v44  ;;  %v2460_v5 = vrot.slane %v2444_v44, %v5251_v11  ;;  %v2467_v14 = vrot.slane %v2445_v45, %v5251_v11  ;;  %v2475_v19 = vcombine.high %v2453_v31, %v2453_v31 }
 0x302   :  { %v3149_v37 = vrot.slane %v3135_v2, %v5251_v11  ;;  %v2750_v38 = vmax.f32 %v2453_v31, 0.0  ;;  %v2493_v40 = vrot.slane %v2479_v1, %v5251_v11  ;;  %v2494_v41 = vcombine.high %v2486_v4, %v2486_v4 }
 0x303   :  { %v2474_v42 = vrot.slane %v2446_v34, %v5251_v11  ;;  %v2476_v43 = vcombine.high %v2460_v5, %v2460_v5  ;;  %v2477_v51 = vcombine.high %v2467_v14, %v2467_v14  ;;  %v2751_v49 = vmax.f32 %v2467_v14, 0.0  ;;  %v3366_v34 = vld [vmem:[#allocation4] ss:$3 sm:$0xff] }
 0x304   :  { %v3150_v48 = vcombine.low %v3142_v32, %v3149_v37  ;;  %v2752_v52 = vmax.f32 %v2475_v19, 0.0  ;;  %v2754_v55 = vmax.f32 %v2460_v5, 0.0  ;;  %v3151_v57 = vcombine.low %v2749_v16, %v2750_v38  ;;  %v3374_v5 = vld [vmem:[#allocation4 + $0x1] ss:$3 sm:$0xff] }
 0x305   :  { %v2478_v60 = vcombine.high %v2474_v42, %v2474_v42  ;;  %v2753_v47 = vmax.f32 %v2477_v51, 0.0  ;;  %v2755_v62 = vmax.f32 %v2474_v42, 0.0  ;;  %v2756_v50 = vmax.f32 %v2476_v43, 0.0 }
 0x306   :  { %3361 = vst.msk [vmem:[#allocation4 + $0x28] sm:$0xff] %vm427_vm4, %v3150_v48  ;;  %v3152_v56 = vcombine.low %v2751_v49, %v2752_v52  ;;  %v3161_v63 = vrot.slane %v3151_v57, %v5251_v11  ;;  %v2495_v29 = vcombine.high %v2493_v40, %v2493_v40  ;;  %v2502_v33 = vrot.slane %v2486_v4, %v5251_v11 }
 0x307   :  { %v3153_v36 = vcombine.low %v2753_v47, %v2754_v55  ;;  %v3154_v39 = vcombine.low %v2755_v62, %v2756_v50  ;;  %v2509_v46 = vrot.slane %v2493_v40, %v5251_v11  ;;  %v2516_v22 = vrot.slane %v2494_v41, %v5251_v11 }
 0x308   :  { %v3168_v35 = vrot.slane %v3152_v56, %v5251_v11  ;;  %v2523_v6 = vrot.slane %v2495_v29, %v5251_v11  ;;  %v2524_v7 = vcombine.high %v2502_v33, %v2502_v33  ;;  %v2757_v8 = vmax.f32 %v2478_v60, 0.0 }
 0x309   :  { %v3175_v9 = vrot.slane %v3153_v36, %v5251_v11  ;;  %v3182_v58 = vrot.slane %v3154_v39, %v5251_v11  ;;  %v2525_v28 = vcombine.high %v2509_v46, %v2509_v46  ;;  %v2526_v12 = vcombine.high %v2516_v22, %v2516_v22 }
 0x30a   :  { %v3183_v13 = vcombine.low %v3161_v63, %v3168_v35  ;;  %v2527_v16 = vcombine.high %v2523_v6, %v2523_v6  ;;  %v2758_v17 = vmax.f32 %v2502_v33, 0.0  ;;  %v2759_v18 = vmax.f32 %v2516_v22, 0.0 }
 0x30b   :  { %v3184_v20 = vcombine.low %v3175_v9, %v3182_v58  ;;  %v2760_v21 = vmax.f32 %v2524_v7, 0.0  ;;  %v2761_v23 = vmax.f32 %v2526_v12, 0.0  ;;  %v2762_v24 = vmax.f32 %v2509_v46, 0.0  ;;  %v3368_v7 = vld [vmem:[#allocation4 + $0x18] ss:$3 sm:$0xf] }
 0x30c   :  { %v3191_v25 = vrot.slane %v3183_v13, %v5251_v11  ;;  %v2763_v26 = vmax.f32 %v2523_v6, 0.0  ;;  %v2764_v27 = vmax.f32 %v2525_v28, 0.0  ;;  %v3200_v30 = vcombine.low %v2757_v8, %v2758_v17  ;;  %v3376_v8 = vld [vmem:[#allocation4 + $0x19] ss:$3 sm:$0xf] }
 0x30d   :  { %v3198_v3 = vrot.slane %v3184_v20, %v5251_v11  ;;  %v3201_v44 = vcombine.low %v2759_v18, %v2760_v21  ;;  %v3202_v45 = vcombine.low %v2761_v23, %v2762_v24  ;;  %v2535_v31 = vrot.slane %v5612_v53, %v5251_v11  ;;  %v3386_v20 = vld [vmem:[#allocation4 + $0x2] ss:$3 sm:$0xff] }
 0x30e   :  { %v3203_v1 = vcombine.low %v2763_v26, %v2764_v27  ;;  %v3210_v2 = vrot.slane %v3200_v30, %v5251_v11  ;;  %v2542_v32 = vrot.slane %v2528_v10, %v5251_v11  ;;  %v2765_v4 = vmax.f32 %v2527_v16, 0.0 }
 0x30f   :  { %v3199_v14 = vcombine.low %v3191_v25, %v3198_v3  ;;  %v3217_v19 = vrot.slane %v3201_v44, %v5251_v11  ;;  %v3224_v37 = vrot.slane %v3202_v45, %v5251_v11  ;;  %v2543_v38 = vcombine.high %v2535_v31, %v2535_v31  ;;  %v3388_v44 = vld [vmem:[#allocation4 + $0x1a] ss:$3 sm:$0xf] }
 0x310   :  { %v3231_v40 = vrot.slane %v3203_v1, %v5251_v11  ;;  %v2544_v41 = vcombine.high %v2542_v32, %v2542_v32  ;;  %v2551_v42 = vrot.slane %v2535_v31, %v5251_v11  ;;  %v2558_v53 = vrot.slane %v2542_v32, %v5251_v11  ;;  %v3398_v32 = vld [vmem:[#allocation4 + $0x3] ss:$3 sm:$0xff] }
 0x311   :  { %3362 = vst.msk [vmem:[#allocation4 + $0x30] sm:$0xff] %vm427_vm4, %v3199_v14  ;;  %v3232_v43 = vcombine.low %v3210_v2, %v3217_v19  ;;  %v2565_v10 = vrot.slane %v2543_v38, %v5251_v11  ;;  %v2123_v51 = vadd.f32 %v5569_v59, %v5479_v15  ;;  %v3381_v49 = vmax.f32 %v3366_v34, %v3374_v5 }
 0x312   :  { %v3233_v48 = vcombine.low %v3224_v37, %v3231_v40  ;;  %v2572_v52 = vrot.slane %v2544_v41, %v5251_v11  ;;  %v2573_v55 = vcombine.high %v2551_v42, %v2551_v42  ;;  %v2574_v57 = vcombine.high %v2558_v53, %v2558_v53  ;;  %v3400_v41 = vld [vmem:[#allocation4 + $0x1b] ss:$3 sm:$0xf] }
 0x313   :  { %v3240_v60 = vrot.slane %v3232_v43, %v5251_v11  ;;  %v2575_v47 = vcombine.high %v2565_v10, %v2565_v10  ;;  %v2766_v62 = vmax.f32 %v2551_v42, 0.0  ;;  %v2767_v50 = vmax.f32 %v2565_v10, 0.0 }
 0x314   :  { %v3247_v56 = vrot.slane %v3233_v48, %v5251_v11  ;;  %v2576_v63 = vcombine.high %v2572_v52, %v2572_v52  ;;  %v2768_v29 = vmax.f32 %v2573_v55, 0.0  ;;  %v2770_v33 = vmax.f32 %v2558_v53, 0.0 }
 0x315   :  { %v2769_v36 = vmax.f32 %v2575_v47, 0.0  ;;  %v2771_v39 = vmax.f32 %v2572_v52, 0.0  ;;  %v2772_v46 = vmax.f32 %v2574_v57, 0.0  ;;  %v3249_v15 = vcombine.low %v2765_v4, %v2766_v62  ;;  %v3412_v62 = vld [vmem:[#allocation4 + $0x1c] ss:$3 sm:$0xf] }
 0x316   :  { %v3248_v59 = vcombine.low %v3240_v60, %v3247_v56  ;;  %v3250_v22 = vcombine.low %v2767_v50, %v2768_v29  ;;  %v2577_v35 = vcombine.high %v2123_v51, %v2123_v51  ;;  %v2584_v6 = vrot.slane %v2123_v51, %v5251_v11  ;;  %v4401_v51 = vld [vmem:[%s5841_s7] ss:$0 sm:$0xff] }
 0x317   :  { %v3251_v9 = vcombine.low %v2769_v36, %v2770_v33  ;;  %v3252_v58 = vcombine.low %v2771_v39, %v2772_v46  ;;  %v3259_v28 = vrot.slane %v3249_v15, %v5251_v11  ;;  %v2773_v12 = vmax.f32 %v2576_v63, 0.0  ;;  %v3410_v60 = vld [vmem:[#allocation4 + $0x4] ss:$3 sm:$0xff] }
 0x318   :  { %3363 = vst.msk [vmem:[#allocation4 + $0x38] sm:$0xff] %vm427_vm4, %v3248_v59  ;;  %v3266_v13 = vrot.slane %v3250_v22, %v5251_v11  ;;  %v2591_v16 = vrot.slane %v2577_v35, %v5251_v11  ;;  %v2592_v17 = vcombine.high %v2584_v6, %v2584_v6  ;;  %v2600_v18 = vrot.slane %v2584_v6, %v5251_v11  ;;  %v4402_v33 = vld [vmem:[%s5842_s8] ss:$0 sm:$0xff] }
 0x319   :  { %v3273_v21 = vrot.slane %v3251_v9, %v5251_v11  ;;  %v3280_v23 = vrot.slane %v3252_v58, %v5251_v11  ;;  %v3382_v24 = vmax.f32 %v3368_v7, %v3376_v8  ;;  %v3393_v25 = vmax.f32 %v3381_v49, %v3386_v20 }
 0x31a   :  { %v3281_v26 = vcombine.low %v3259_v28, %v3266_v13  ;;  %v2593_v27 = vcombine.high %v2591_v16, %v2591_v16  ;;  %v2607_v30 = vrot.slane %v2591_v16, %v5251_v11  ;;  %v2614_v3 = vrot.slane %v2592_v17, %v5251_v11 }
 0x31b   :  { %v3282_v45 = vcombine.low %v3273_v21, %v3280_v23  ;;  %v2622_v31 = vcombine.high %v2600_v18, %v2600_v18  ;;  %v2774_v1 = vmax.f32 %v2600_v18, 0.0  ;;  %v3394_v2 = vmax.f32 %v3382_v24, %v3388_v44  ;;  %v4826_v21 = vld [vmem:[%s5843_s9 + $0x58] sm:$0xff]   ;;  %v4829_v44 = vld [vmem:[%s5843_s9 + $0x10] sm:$0xff]  }
 0x31c   :  { %v3289_v4 = vrot.slane %v3281_v26, %v5251_v11  ;;  %v2621_v34 = vrot.slane %v2593_v27, %v5251_v11  ;;  %v2623_v5 = vcombine.high %v2614_v3, %v2614_v3  ;;  %v2775_v14 = vmax.f32 %v2614_v3, 0.0  ;;  %4541 = vmatprep.subr.bf16.mxu1 %v4826_v21  ;;  %v4828_v3 = vld [vmem:[%s5843_s9 + $0x50] sm:$0xff]  }
 0x31d   :  { %v3296_v19 = vrot.slane %v3282_v45, %v5251_v11  ;;  %v2776_v37 = vmax.f32 %v2622_v31, 0.0  ;;  %v2778_v38 = vmax.f32 %v2607_v30, 0.0  ;;  %v3298_v40 = vcombine.low %v2773_v12, %v2774_v1 }
 0x31e   :  { %v2777_v42 = vmax.f32 %v2623_v5, 0.0  ;;  %v2779_v53 = vmax.f32 %v2621_v34, 0.0  ;;  %v3405_v43 = vmax.f32 %v3393_v25, %v3398_v32  ;;  %v3406_v10 = vmax.f32 %v3394_v2, %v3400_v41  ;;  %v4830_v41 = vld [vmem:[%s5843_s9 + $0x48] sm:$0xff]  }
 0x31f   :  { %v3297_v49 = vcombine.low %v3289_v4, %v3296_v19  ;;  %v3299_v48 = vcombine.low %v2775_v14, %v2776_v37  ;;  %v3307_v52 = vrot.slane %v3298_v40, %v5251_v11  ;;  %v3370_v55 = vld [vmem:[#allocation4 + $0x28] ss:$3 sm:$0xff]  ;;  %v3378_v57 = vld [vmem:[#allocation4 + $0x29] ss:$3 sm:$0xff]  ;;  %v3390_v35 = vld [vmem:[#allocation4 + $0x2a] ss:$3 sm:$0xff] }
 0x320   :  { %v3300_v47 = vcombine.low %v2777_v42, %v2778_v38  ;;  %v3417_v50 = vmax.f32 %v3405_v43, %v3410_v60  ;;  %v3383_v63 = vmax.f32 %v3370_v55, %v3378_v57  ;;  %v3418_v29 = vmax.f32 %v3406_v10, %v3412_v62  ;;  %v4831_v10 = vld [vmem:[%s5843_s9 + $0x8] sm:$0xff]  }
 0x321   :  { %3364 = vst.msk [vmem:[#allocation4 + $0x40] sm:$0xff] %vm427_vm4, %v3297_v49  ;;  %v3314_v56 = vrot.slane %v3299_v48, %v5251_v11  ;;  %v3328_v39 = vrot.slane %v2779_v53, %v5251_v11  ;;  %v4884_v38 = vmov 1983009808  }
 0x322   :  { %v3321_v36 = vrot.slane %v3300_v47, %v5251_v11  ;;  %v3428_v46 = vmul.f32 %v4401_v51, %v3417_v50  ;;  %v3429_v59 = vmul.f32 %v4401_v51, %v3418_v29  ;;  %v3395_v7 = vmax.f32 %v3383_v63, %v3390_v35  ;;  %v4832_v63 = vld [vmem:[%s5843_s9 + $0x40] sm:$0xff]  }
 0x323   :  { %v3329_v15 = vcombine.low %v3307_v52, %v3314_v56  ;;  %v3570_v40 = vunpack.c.l.s4 %v4884_v38  ;;  %v4833_v29 = vld [vmem:[%s5843_s9] sm:$0xff]  }
 0x324   :  { %v3330_v22 = vcombine.low %v3321_v36, %v3328_v39  ;;  %v3439_v6 = vadd.f32 %v4402_v33, %v3428_v46  ;;  %v3440_v8 = vadd.f32 %v4402_v33, %v3429_v59 }
 0x325   :  { %v3337_v9 = vrot.slane %v3329_v15, %v5251_v11  ;;  %v3571_v42 = vunpack.c.0.s8 %v3570_v40 }
 0x326   :  { %v3344_v58 = vrot.slane %v3330_v22, %v5251_v11  ;;  %3443 = vst.msk [vmem:[#allocation5 + $0x2] sm:$0xff] %vm427_vm4, %v3439_v6  ;;  %v4827_v11 = vld [vmem:[%s5843_s9 + $0x18] sm:$0xff]  }
 0x327   :  { %3445 = vst.msk [vmem:[#allocation5 + $0xa] sm:$0xf] %vm3444_vm6, %v3440_v8  ;;  %4542 = vmatpush3.bf16.msra.mxu1 %v4827_v11  ;;  %v5705_v55 = vsub.s32 %v3571_v42, %v5248_v61 }
 0x328   :  { %v3345_v28 = vcombine.low %v3337_v9, %v3344_v58  ;;  %v3402_v12 = vld [vmem:[#allocation4 + $0x2b] ss:$3 sm:$0xff]  ;;  %v3414_v16 = vld [vmem:[#allocation4 + $0x2c] ss:$3 sm:$0xff]  ;;  %4543 = vmatprep.subr.bf16.mxu1 %v4828_v3 }
 0x329   :  { %v3407_v13 = vmax.f32 %v3395_v7, %v3402_v12 }
 0x32a   :  { %3365 = vst.msk [vmem:[#allocation4 + $0x48] sm:$0x7f] %vm635_vm5, %v3345_v28 }
 0x32b   :  { %v3419_v17 = vmax.f32 %v3407_v13, %v3414_v16  ;;  %4544 = vmatpush3.bf16.msra.mxu1 %v4829_v44 }
 0x32c   :  { %4545 = vmatprep.subr.bf16.mxu1 %v4830_v41 }
 0x32d   :  { %v3430_v18 = vmul.f32 %v4401_v51, %v3419_v17  ;;  %v3452_v14 = vld [vmem:[#allocation5 + $0x1] sm:$0xff] }
 0x32e   :  { %v3453_v1 = vld [vmem:[#allocation5 + $0x9] sm:$0xf]  ;;  %v3448_v58 = vld [vmem:[#allocation5] sm:$0xff] }
 0x32f   :  { %v3441_v20 = vadd.f32 %v4402_v33, %v3430_v18  ;;  %v3460_v34 = vld [vmem:[#allocation5 + $0x3] sm:$0xff]  ;;  %v3465_v43 = vld [vmem:[#allocation5 + $0xc] sm:$0xf]  ;;  %4546 = vmatpush3.bf16.msra.mxu1 %v4831_v10 }
 0x330   :  { %v4767_v37 = vpack.i.bf16 %v3460_v34, %v3452_v14  ;;  %v3464_v53 = vld [vmem:[#allocation5 + $0x4] sm:$0xff]  ;;  %v4406_v52 = vpack.c.bf16 %v3465_v43, %v3465_v43  ;;  %4547 = vmatprep.subr.bf16.mxu1 %v4832_v63  ;;  %v4885_v63 = vmov 0  }
 0x331   :  { %3446 = vst.msk [vmem:[#allocation5 + $0x12] sm:$0xff] %vm427_vm4, %v3441_v20  ;;  %v3372_v23 = vld [vmem:[#allocation4 + $0x40] ss:$3 sm:$0xf]  ;;  %v3510_v48 = vpack.c.bf16 %v3465_v43, %v3464_v53  ;;  %v3456_v9 = vld [vmem:[#allocation5 + $0x2] sm:$0xff] }
 0x332   :  { %v3380_v24 = vld [vmem:[#allocation4 + $0x41] ss:$3 sm:$0xf]  ;;  %v3392_v26 = vld [vmem:[#allocation4 + $0x42] ss:$3 sm:$0xf]  ;;  %v3596_v61 = vrot.slane %v4406_v52, %v5705_v55 }
 0x333   :  { %v3384_v25 = vmax.f32 %v3372_v23, %v3380_v24  ;;  %v3404_v30 = vld [vmem:[#allocation4 + $0x43] ss:$3 sm:$0xf]  ;;  %v3416_v31 = vld [vmem:[#allocation4 + $0x44] ss:$3 sm:$0xf]  ;;  %4548 = vmatpush3.bf16.msra.mxu1 %v4833_v29 }
 0x334   :  { %v3449_v18 = vld [vmem:[#allocation5 + $0x8] sm:$0xf]  ;;  %4115 = vmatprep.subr.bf16.mxu1 %v4885_v63  ;;  %v4835_v29 = vld [vmem:[%s5847_s13 + $0x30] sm:$0xff]  }
 0x335   :  { %v3396_v27 = vmax.f32 %v3384_v25, %v3392_v26  ;;  %v3457_v25 = vld [vmem:[#allocation5 + $0xa] sm:$0xf] }
 0x337   :  { %v3408_v45 = vmax.f32 %v3396_v27, %v3404_v30 }
 0x338   :  { %v3454_v2 = vld [vmem:[#allocation5 + $0x11] sm:$0xff] }
 0x339   :  { %v3420_v32 = vmax.f32 %v3408_v45, %v3416_v31  ;;  %v4757_v4 = vpack.i.bf16 %v3454_v2, %v3453_v1  ;;  %v3450_v11 = vld [vmem:[#allocation5 + $0x10] sm:$0xff] }
 0x33a   :  { %v3458_v24 = vld [vmem:[#allocation5 + $0x12] sm:$0xff] }
 0x33b   :  { %v3431_v5 = vmul.f32 %v4401_v51, %v3420_v32  ;;  %4758 = vrot.lane.b32.xlu0 %v4757_v4, %s4882_s18  ;;  %v3461_v51 = vld [vmem:[#allocation5 + $0xb] sm:$0xf] }
 0x33d   :  { %v3442_v19 = vadd.f32 %v4402_v33, %v3431_v5  ;;  %v3589_v33 = vrot.slane %v3510_v48, %v5705_v55 }
 0x33f   :  { %3447 = vst.msk [vmem:[#allocation5 + $0x1a] sm:$0xf] %vm3444_vm6, %v3442_v19  ;;  %4768 = vrot.lane.b32.xlu0 %v4767_v37, %s4882_s18  ;;  %v3652_v15 = vrot.slane %v3589_v33, %v5705_v55  ;;  %v4837_v33 = vld [vmem:[%s5847_s13 + $0x20] sm:$0xff]  }
 0x346   :  { %v3462_v49 = vld [vmem:[#allocation5 + $0x13] sm:$0xff]  ;;  %v3467_v62 = vld [vmem:[#allocation5 + $0x1c] sm:$0xf] }
 0x347   :  { %v4762_v57 = vpack.i.bf16 %v3462_v49, %v3461_v51  ;;  %v3455_v60 = vld [vmem:[#allocation5 + $0x19] sm:$0xf]  ;;  %v4409_v1 = vpack.c.bf16 %v3467_v62, %v3467_v62 }
 0x348   :  { %v3466_v47 = vld [vmem:[#allocation5 + $0x14] sm:$0xff] }
 0x349   :  { %v3463_v50 = vld [vmem:[#allocation5 + $0x1b] sm:$0xf]  ;;  %v3513_v56 = vpack.c.bf16 %v3467_v62, %v3466_v47  ;;  %4763 = vrot.lane.b32.xlu1 %v4762_v57, %s4882_s18  ;;  %v3630_v42 = vrot.slane %v4409_v1, %v5705_v55 }
 0x34a   :  { %v4772_v39 = vpack.i.bf16 %v3463_v50, %v3455_v60  ;;  %v3451_v5 = vld [vmem:[#allocation5 + $0x18] sm:$0xf] }
 0x34b   :  { %v3623_v36 = vrot.slane %v3513_v56, %v5705_v55  ;;  %v3459_v14 = vld [vmem:[#allocation5 + $0x1a] sm:$0xf] }
 0x34c   :  { %v4834_v56 = vld [vmem:[%s5847_s13 + $0x38] sm:$0xff]  }
 0x34d   :  { %v4411_v46 = vcombine.low %v3596_v61, %v3623_v36  ;;  %4773 = vrot.lane.b32.xlu1 %v4772_v39, %s4882_s18  ;;  %v4838_v61 = vld [vmem:[%s5847_s13 + $0x18] sm:$0xff]   ;;  %v4840_v39 = vld [vmem:[%s5847_s13 + $0x8] sm:$0xff]  }
 0x34f   :  { %v3666_v59 = vrot.slane %v4411_v46, %v5705_v55  ;;  %v4841_v46 = vld [vmem:[%s5847_s13] sm:$0xff]  }
 0x351   :  { %v3669_v22 = vcombine.low %v3652_v15, %v3666_v59  ;;  %v4842_v15 = vld [vmem:[%s5847_s13 + $0x58] sm:$0xff]   ;;  %v4843_v59 = vld [vmem:[%s5847_s13 + $0x50] sm:$0xff]  }
 0x353   :  { %4676 = vmatprep.mubr.msk.bf16.mxu0 %vm427_vm4, %v3669_v22  ;;  %v4844_v22 = vld [vmem:[%s5847_s13 + $0x48] sm:$0xff]  }
 0x3ad   :  { %v4759_v35 = vpop.permute.xlu0 %4758 }
 0x3ae   :  { %v4761_v28 = vunpack.i.h.bf16 %v4759_v35  ;;  %v4760_v12 = vunpack.i.l.bf16 %v4759_v35  ;;  %v4403_v35 = vld [vmem:[%s5844_s10] ss:$0 sm:$0xff] }
 0x3b0   :  { %v3502_v26 = vsel %vm427_vm4, %v3450_v11, %v4761_v28  ;;  %v3501_v27 = vsel %vm427_vm4, %v3449_v18, %v4760_v12 }
 0x3b1   :  { %v4769_v6 = vpop.permute.xlu0 %4768 }
 0x3b2   :  { %v4771_v7 = vunpack.i.h.bf16 %v4769_v6  ;;  %v4770_v8 = vunpack.i.l.bf16 %v4769_v6  ;;  %v3634_v6 = vcombine.high %v4403_v35, %v4403_v35 }
 0x3b4   :  { %v3504_v13 = vsel %vm427_vm4, %v3456_v9, %v4771_v7  ;;  %v3500_v16 = vsel %vm427_vm4, %v3448_v58, %v4770_v8  ;;  %v3811_v8 = vcombine.low %v4403_v35, %v3634_v6 }
 0x3b5   :  { %v4404_v23 = vpack.c.bf16 %v3504_v13, %v3500_v16 }
 0x3b7   :  { %v3575_v19 = vrot.slane %v4404_v23, %v5705_v55 }
 0x3b9   :  { %v3645_v43 = vrot.slane %v3575_v19, %v5705_v55 }
 0x3bb   :  { %v4764_v17 = vpop.permute.xlu1 %4763 }
 0x3bc   :  { %v4766_v20 = vunpack.i.h.bf16 %v4764_v17  ;;  %v4765_v21 = vunpack.i.l.bf16 %v4764_v17  ;;  %v3812_v17 = vcombine.low %v4403_v35, %v4403_v35 }
 0x3be   :  { %v3506_v30 = vsel %vm427_vm4, %v3458_v24, %v4766_v20  ;;  %v3505_v3 = vsel %vm427_vm4, %v3457_v25, %v4765_v21 }
 0x3bf   :  { %v4405_v44 = vpack.c.bf16 %v3505_v3, %v3501_v27  ;;  %v4407_v45 = vpack.c.bf16 %v3506_v30, %v3502_v26  ;;  %v4774_v31 = vpop.permute.xlu1 %4773  ;;  %v3813_v27 = vcombine.low %v3634_v6, %v4403_v35  ;;  %v4848_v6 = vld [vmem:[%s5849_s15 + $0x28] sm:$0xff]  }
 0x3c0   :  { %v4776_v2 = vunpack.i.h.bf16 %v4774_v31  ;;  %v4775_v32 = vunpack.i.l.bf16 %v4774_v31 }
 0x3c1   :  { %v3582_v4 = vrot.slane %v4405_v44, %v5705_v55  ;;  %v3609_v34 = vrot.slane %v4407_v45, %v5705_v55 }
 0x3c2   :  { %v3507_v37 = vsel %vm427_vm4, %v3459_v14, %v4776_v2  ;;  %v3503_v38 = vsel %vm427_vm4, %v3451_v5, %v4775_v32 }
 0x3c3   :  { %v4408_v40 = vpack.c.bf16 %v3507_v37, %v3503_v38  ;;  %v4410_v41 = vcombine.low %v3582_v4, %v3609_v34  ;;  %v3632_v51 = vcombine.high %v3609_v34, %v3623_v36 }
 0x3c5   :  { %v3616_v53 = vrot.slane %v4408_v40, %v5705_v55  ;;  %v3659_v10 = vrot.slane %v4410_v41, %v5705_v55 }
 0x3c7   :  { %v3633_v49 = vcombine.low %v3616_v53, %v3630_v42  ;;  %v3667_v48 = vcombine.low %v3645_v43, %v3659_v10  ;;  %v3668_v52 = vcombine.high %v3645_v43, %v3659_v10  ;;  %v4412_v57 = vcombine.low %v3632_v51, %v3616_v53 }
 0x3c9   :  { %v4413_v60 = vcombine.high %v3623_v36, %v3633_v49  ;;  %3855 = vmatprep.mubr.bf16.mxu1 %v3668_v52  ;;  %v3678_v47 = vrot.slane %v4412_v57, %v5705_v55  ;;  %v4839_v36 = vld [vmem:[%s5847_s13 + $0x10] sm:$0xff]   ;;  %v4436_v57 = vld [vmem:[%s5845_s11] ss:$0 sm:$0xff] }
 0x3ca   :  { %3856 = vmatmul.mubr.bf16.vlgmr.msra.gmra.mxu1 %v3667_v48 }
 0x3cb   :  { %v3685_v62 = vrot.slane %v4413_v60, %v5705_v55  ;;  %v3686_v50 = vcombine.high %v3678_v47, %v3678_v47  ;;  %4116 = vmatpush1.bf16.msra.mxu1 %v4834_v56  ;;  %v4836_v55 = vld [vmem:[%s5847_s13 + $0x28] sm:$0xff]  }
 0x3cc   :  { %4117 = vmatprep.subr.bf16.mxu1 %v4885_v63 }
 0x3cd   :  { %3863 = vmatprep.mubr.bf16.mxu1 %v3686_v50  ;;  %4677 = vmatmul.mubr.msk.bf16.vlgmr.msra.gmra.mxu0 %vm427_vm4, %v3685_v62 }
 0x3ce   :  { %4696 = vmatprep.mubr.msk.bf16.mxu0 %vm4881_vm1, %v4880_v0 }
 0x3cf   :  { %4118 = vmatpush1.bf16.msra.mxu1 %v4835_v29 }
 0x3d0   :  { %4119 = vmatprep.subr.bf16.mxu1 %v4885_v63 }
 0x3d2   :  { %3864 = vmatmul.mubr.bf16.gmra.mxu1 %v3678_v47 }
 0x3d3   :  { %4120 = vmatpush1.bf16.msra.mxu1 %v4836_v55 }
 0x3d4   :  { %4121 = vmatprep.subr.bf16.mxu1 %v4885_v63 }
 0x3d7   :  { %4122 = vmatpush1.bf16.msra.mxu1 %v4837_v33 }
 0x3d8   :  { %4123 = vmatprep.subr.bf16.mxu1 %v4885_v63 }
 0x3db   :  { %4124 = vmatpush1.bf16.msra.mxu1 %v4838_v61  ;;  %v4437_v61 = vld [vmem:[%s5846_s12] ss:$0 sm:$0xff] }
 0x3dc   :  { %4125 = vmatprep.subr.bf16.mxu1 %v4885_v63 }
 0x3df   :  { %4126 = vmatpush1.bf16.msra.mxu1 %v4839_v36  ;;  %v4846_v36 = vld [vmem:[%s5849_s15 + $0x38] sm:$0xff]  }
 0x3e0   :  { %4127 = vmatprep.subr.bf16.mxu1 %v4885_v63  ;;  %4681 = vmatpush3.bf16.msra.mxu0 %v4846_v36 }
 0x3e1   :  { %4682 = vmatprep.subr.bf16.mxu0 %v4880_v0 }
 0x3e3   :  { %4128 = vmatpush1.bf16.msra.mxu1 %v4840_v39 }
 0x3e4   :  { %4129 = vmatprep.subr.bf16.mxu1 %v4885_v63 }
 0x3e7   :  { %4130 = vmatpush1.bf16.msra.mxu1 %v4841_v46 }
 0x3e8   :  { %4139 = vmatprep.subr.bf16.mxu1 %v4885_v63 }
 0x3eb   :  { %4140 = vmatpush2.bf16.msra.mxu1 %v4842_v15  ;;  %v4847_v15 = vld [vmem:[%s5849_s15 + $0x30] sm:$0xff]  }
 0x3ec   :  { %4141 = vmatprep.subr.bf16.mxu1 %v4885_v63  ;;  %4683 = vmatpush3.bf16.msra.mxu0 %v4847_v15 }
 0x3ed   :  { %4684 = vmatprep.subr.bf16.mxu0 %v4880_v0 }
 0x3ef   :  { %4142 = vmatpush2.bf16.msra.mxu1 %v4843_v59 }
 0x3f0   :  { %4143 = vmatprep.subr.bf16.mxu1 %v4885_v63  ;;  %4685 = vmatpush3.bf16.msra.mxu0 %v4848_v6 }
 0x3f1   :  { %4686 = vmatprep.subr.bf16.mxu0 %v4880_v0 }
 0x3f3   :  { %4144 = vmatpush2.bf16.msra.mxu1 %v4844_v22 }
 0x3f4   :  { %4145 = vmatprep.subr.bf16.mxu1 %v4885_v63  ;;  %v4845_v63 = vld [vmem:[%s5847_s13 + $0x40] sm:$0xff]  }
 0x3f7   :  { %4146 = vmatpush2.bf16.msra.mxu1 %v4845_v63 }
 0x48a   :  { %v4549_v7 = vpop.f32.mrf.mxu1 }
 0x48c   :  { %v4550_v9 = vpop.f32.mrf.mxu1 }
 0x48d   :  { %v4551_v58 = vadd.f32 %v4550_v9, %v4549_v7  ;;  %v4678_v28 = vpop.f32.mrf.mxu0 }
 0x48e   :  { %v4552_v12 = vpop.f32.mrf.mxu1 }
 0x48f   :  { %v3858_v13 = vadd.f32 %v4551_v58, %v3811_v8  ;;  %v3905_v16 = vpop.f32.mrf.mxu0 }
 0x490   :  { %v4553_v18 = vpop.f32.mrf.mxu1 }
 0x491   :  { %v3906_v20 = vadd.f32 %v3905_v16, %v3858_v13  ;;  %v4554_v21 = vadd.f32 %v4553_v18, %v4552_v12  ;;  %v4679_v11 = vpop.f32.mrf.mxu0  ;;  %v4849_v13 = vld [vmem:[%s5849_s15 + $0x20] sm:$0xff]  }
 0x492   :  { %v4555_v23 = vpop.f32.mrf.mxu1  ;;  %4687 = vmatpush3.bf16.msra.mxu0 %v4849_v13 }
 0x493   :  { %v3922_v24 = vcombine.high %v3906_v20, %v3906_v20  ;;  %v3861_v25 = vadd.f32 %v4554_v21, %v3812_v17  ;;  %v3908_v26 = vpop.f32.mrf.mxu0  ;;  %v3928_v3 = vmax.f32 %v3906_v20, 0.0  ;;  %v4850_v20 = vld [vmem:[%s5849_s15 + $0x18] sm:$0xff]   ;;  %4688 = vmatprep.subr.bf16.mxu0 %v4880_v0  ;;  %v4851_v21 = vld [vmem:[%s5849_s15 + $0x10] sm:$0xff]  }
 0x494   :  { %v4556_v30 = vpop.f32.mrf.mxu1 }
 0x495   :  { %v3929_v44 = vmax.f32 %v3922_v24, 0.0  ;;  %v3909_v45 = vadd.f32 %v3908_v26, %v3861_v25  ;;  %v4557_v31 = vadd.f32 %v4556_v30, %v4555_v23  ;;  %v4852_v25 = vld [vmem:[%s5849_s15 + $0x8] sm:$0xff]   ;;  %v4853_v26 = vld [vmem:[%s5849_s15] sm:$0xff]  }
 0x496   :  { %v4558_v1 = vpop.f32.mrf.mxu1  ;;  %4689 = vmatpush3.bf16.msra.mxu0 %v4850_v20 }
 0x497   :  { %v3938_v2 = vcombine.low %v3928_v3, %v3929_v44  ;;  %v3923_v32 = vcombine.high %v3909_v45, %v3909_v45  ;;  %v3930_v4 = vmax.f32 %v3909_v45, 0.0  ;;  %v3866_v34 = vadd.f32 %v4557_v31, %v3813_v27  ;;  %4690 = vmatprep.subr.bf16.mxu0 %v4880_v0  ;;  %v4438_v27 = vld [vmem:[%s5848_s14] ss:$0 sm:$0xff]  ;;  %s4886_s14 = smov [#allocation7]  }
 0x498   :  { %v4559_v5 = vpop.f32.mrf.mxu1  ;;  %s4292_s15 = sshll.u32 %s4886_s14, 4  ;;  %s4293_s15 = int_to_ptr.vmem [resolvable:$true] %s4292_s15 }
 0x499   :  { %3942 = vst.msk [vmem:[#allocation6] sm:$0xff] %vm427_vm4, %v3938_v2  ;;  %v3914_v14 = vadd.f32 %v4678_v28, %v3866_v34  ;;  %v3931_v19 = vmax.f32 %v3923_v32, 0.0  ;;  %v4270_v32 = vand.u32 127, %v880_v54  ;;  %p4863_p1 = scmp.lt.s32.totalorder %s4293_s15, %s4293_s15 }
 0x49a   :  { %3943 = vst.msk [vmem:[#allocation6 + $0x8] sm:$0xf] %vm3444_vm6, %v3930_v4  ;;  %4691 = vmatpush3.bf16.msra.mxu0 %v4851_v21 }
 0x49b   :  { %v3924_v37 = vcombine.high %v3914_v14, %v3914_v14  ;;  %v3932_v38 = vmax.f32 %v3914_v14, 0.0  ;;  %4692 = vmatprep.subr.bf16.mxu0 %v4880_v0  ;;  %vm4271_vm8 = vcmp.lt.s32.totalorder %v4270_v32, 8 }
 0x49d   :  { %v3933_v40 = vmax.f32 %v3924_v37, 0.0  ;;  %v3939_v41 = vcombine.low %v3931_v19, %v3932_v38 }
 0x49e   :  { %4693 = vmatpush3.bf16.msra.mxu0 %v4852_v25 }
 0x49f   :  { %3944 = vst.msk [vmem:[#allocation6 + $0x10] sm:$0xff] %vm427_vm4, %v3939_v41  ;;  %4694 = vmatprep.subr.bf16.mxu0 %v4880_v0  ;;  %v4452_v0 = vld [vmem:[%s5850_s16] ss:$0 sm:$0xff]  ;;  %s4858_s16 = scalar_lea.vmem %s4293_s15, 32 }
 0x4a0   :  { %3945 = vst.msk [vmem:[#allocation6 + $0x18] sm:$0xf] %vm3444_vm6, %v3933_v40  ;;  %v3946_v42 = vld [vmem:[#allocation6] ss:$3 sm:$0x7]  ;;  %p4859_p0 = scmp.ne.s32.totalorder %s4293_s15, %s4858_s16  ;;  %p4864_p2 = scmp.lt.s32.totalorder %s4858_s16, %s4858_s16 }
 0x4a1   :  { %v3950_v53 = vld [vmem:[#allocation6 + $0x1] ss:$3 sm:$0x7]  ;;  %v3956_v10 = vld [vmem:[#allocation6 + $0x2] ss:$3 sm:$0x7] }
 0x4a2   :  { %v3953_v43 = vmax.f32 %v3946_v42, %v3950_v53  ;;  %v3962_v49 = vld [vmem:[#allocation6 + $0x3] ss:$3 sm:$0x7]  ;;  %v3968_v52 = vld [vmem:[#allocation6 + $0x4] ss:$3 sm:$0x7]  ;;  %4695 = vmatpush3.bf16.msra.mxu0 %v4853_v26  ;;  %p4865_p3 = por %p4864_p2, %p4863_p1 }
 0x4a4   :  { %v3959_v51 = vmax.f32 %v3953_v43, %v3956_v10  ;;  %p4866_p4 = pnand %p4865_p3, %p4859_p0 }
 0x4a6   :  { %v3965_v48 = vmax.f32 %v3959_v51, %v3962_v49  ;;  %v3948_v60 = vld [vmem:[#allocation6 + $0x10] ss:$3 sm:$0x7]  ;;  %v3952_v47 = vld [vmem:[#allocation6 + $0x11] ss:$3 sm:$0x7] }
 0x4a7   :  { %v3954_v62 = vmax.f32 %v3948_v60, %v3952_v47  ;;  %v3958_v56 = vld [vmem:[#allocation6 + $0x12] ss:$3 sm:$0x7]  ;;  %v3964_v33 = vld [vmem:[#allocation6 + $0x13] ss:$3 sm:$0x7] }
 0x4a8   :  { %v3971_v50 = vmax.f32 %v3965_v48, %v3968_v52  ;;  %v3970_v46 = vld [vmem:[#allocation6 + $0x14] ss:$3 sm:$0x7] }
 0x4a9   :  { %v3960_v29 = vmax.f32 %v3954_v62, %v3958_v56 }
 0x4aa   :  { %v3980_v55 = vmul.f32 %v4436_v57, %v3971_v50 }
 0x4ab   :  { %v3966_v39 = vmax.f32 %v3960_v29, %v3964_v33 }
 0x4ac   :  { %v3989_v22 = vadd.f32 %v4437_v61, %v3980_v55 }
 0x4ad   :  { %v3972_v59 = vmax.f32 %v3966_v39, %v3970_v46 }
 0x4ae   :  { %v3997_v8 = vrot.slane %v3989_v22, 1  ;;  %v4002_v58 = vrot.slane %v3989_v22, 2 }
 0x4af   :  { %v3981_v35 = vmul.f32 %v4436_v57, %v3972_v59 }
 0x4b1   :  { %v3990_v7 = vadd.f32 %v4437_v61, %v3981_v35 }
 0x4b3   :  { %v3998_v9 = vsel %vm3994_vm7, %v3990_v7, %v3997_v8  ;;  %v4003_v28 = vrot.slane %v3990_v7, 1  ;;  %v3993_v12 = vrot.slane %v3990_v7, 7 }
 0x4b4   :  { %3999 = vrot.lane.b32.xlu0 %v3998_v9, %s4882_s18 }
 0x4b5   :  { %v4004_v16 = vsel %vm3994_vm7, %v4003_v28, %v4002_v58  ;;  %v3995_v17 = vsel %vm3994_vm7, %v3993_v12, %v3989_v22 }
 0x4b6   :  { %v4008_v18 = vpack.c.bf16 %v4004_v16, %v4004_v16 }
 0x4b8   :  { %4451 = vmatprep.mubr.msk.bf16.mxu1 %vm427_vm4, %v4008_v18 }
 0x526   :  { %v4000_v11 = vpop.permute.xlu0 %3999 }
 0x527   :  { %v4006_v23 = vsel %vm427_vm4, %v3995_v17, %v4000_v11 }
 0x528   :  { %v4007_v24 = vpack.c.bf16 %v4006_v23, %v4006_v23 }
 0x52a   :  { %4148 = vmatmul.mubr.bf16.vlgmr.msra.gmra.mxu1 %v4007_v24 }
 0x5ea   :  { %v4149_v30 = vpop.f32.mrf.mxu1 }
 0x5eb   :  { %v4150_v3 = vadd.f32 %v4438_v27, %v4149_v30 }
 0x5ec   :  { %v4151_v44 = vpop.f32.mrf.mxu1 }
 0x5ed   :  { %v4155_v45 = vmax.f32 %v4150_v3, 0.0 }
 0x5ee   :  { %v4152_v31 = vpop.f32.mrf.mxu1 }
 0x5ef   :  { %v4156_v1 = vpack.c.bf16 %v4155_v45, %v4155_v45 }
 0x5f0   :  { %v4153_v2 = vpop.f32.mrf.mxu1 }
 0x5f1   :  { %4697 = vmatmul.mubr.bf16.vlgmr.msra.gmra.mxu0 %v4156_v1 }
 0x6b1   :  { %v4262_v4 = vpop.f32.mrf.mxu0 }
 0x6b2   :  { %v4263_v34 = vadd.f32 %v4452_v0, %v4262_v4 }
 0x6b3   :  { %v4698_v5 = vpop.f32.mrf.mxu0 }
 0x6b4   :  { %v4268_v14 = vmax.f32 %v4263_v34, 0.0 }
 0x6b5   :  { %v4265_v19 = vpop.f32.mrf.mxu0 }
 0x6b6   :  { %v4272_v37 = vsel %vm4271_vm8, %v4268_v14, -1e+30 }
 0x6b7   :  { %v4699_v38 = vpop.f32.mrf.mxu0  ;;  %v4274_v40 = vsel %vm4273_vm9, %v4272_v37, -inf }
 0x6b8   :  { %4275 = vmax.xlane.f32.xlu1 %v4274_v40 }
 0x741   :  { %v4276_v41 = vpop.xlane.xlu1 %4275 }
 0x742   :  { %v4277_v42 = vsub.f32 %v4272_v37, %v4276_v41 }
 0x744   :  { %v4278_v53 = vmul.f32 1.442695, %v4277_v42 }
 0x746   :  { %4854 = vpow2.f32 %v4278_v53 }
 0x753   :  { %v4855_v43 = vpop.eup %4854 }
 0x754   :  { %v4280_v10 = vsel %vm4273_vm9, %v4855_v43, 0.0 }
 0x755   :  { %4281 = vadd.xlane.f32.xlu0 %v4280_v10 }
 0x7de   :  { %v4282_v51 = vpop.xlane.xlu0 %4281 }
 0x7df   :  { %4856 = vrcp.f32 %v4282_v51 }
 0x7ec   :  { %v4857_v54 = vpop.eup %4856 }
 0x7ed   :  { %v4284_v49 = vmul.f32 %v4857_v54, %v4855_v43 }
 0x7ef   :  { %4285 = vst [vmem:[#allocation7] sm:$0x3] %v4284_v49 }
 0x7f0   :  { %4869 = shalt.err (!%p4866_p4)
}
 0x7f1   :  { %4295 = dma.vmem_to_hbm [thread:$0]  %s4293_s15, 32, %s5851_s17, [#allocation8]  }
 0x7f2   :  { %4878 = dma.done.wait [#allocation8], 32  }
 0x7f3   :  { %4879 = vsyncadd [#allocation8], 4294967264 }
 0x7f4   :  { %4299 = vsyncpa [#allocation8], 1 }

</bundles_post_ra>
